<compile_context>
chip_gen: v7x
topology: tpu7x:2x2x1
jax: 0.10.0
libtpu: 0.0.40
codegen_flags: <defaults>
</compile_context>

<pallas_src>
import functools

import numpy as np
import jax
import jax.numpy as jnp
from jax import lax
from jax.experimental import pallas as pl
from jax.experimental.pallas import tpu as pltpu

BN_EPS = 1e-5

_COMPILER = pltpu.CompilerParams(
    dimension_semantics=("parallel",),
    vmem_limit_bytes=48 * 1024 * 1024,
)


# ----------------------------- tile-size selection -----------------------------

def _pick_rows_tile(total_rows, target=64):
    """Largest even divisor of total_rows <= target that keeps >= 2 grid steps
    (so the 'parallel' axis can shard across v7x's two TensorCores)."""
    assert total_rows % 2 == 0
    cand = min(target, max(total_rows // 2, 2))
    cand -= cand % 2
    cand = max(cand, 2)
    while total_rows % cand:
        cand -= 2
    return cand


def _pick_tile(total, target=64):
    cand = max(1, min(target, max(total // 2, 1)))
    while total % cand:
        cand -= 1
    return cand


# ----------------------------- Pallas kernels -----------------------------

def _conv_bias_stats_kernel(x_ref, w_ref, b_ref, y_ref, stat_ref):
    """Row tile of the convolution as ONE deep-contraction matmul + bias + BN partial stats.

    x_ref:    (TH, W, K*K*Cin)  bf16  -- im2col rows for TH image rows
    w_ref:    (K*K*Cin, Cout)   bf16  -- rows ordered (kh, kw, cin)
    b_ref:    (1, Cout)         f32
    y_ref:    (TH//2, 2, W, Cout) f32 -- conv+bias output, image rows grouped in pairs
    stat_ref: (1, 2, Cout)      f32   -- per-tile [sum, sum of squares]
    """
    TH, W, KKC = x_ref.shape
    Cout = w_ref.shape[1]
    xs = x_ref[...].reshape(TH * W, KKC)
    y = jnp.dot(xs, w_ref[...], preferred_element_type=jnp.float32) + b_ref[...]
    stat_ref[0, 0:1, :] = jnp.sum(y, axis=0, keepdims=True)
    stat_ref[0, 1:2, :] = jnp.sum(y * y, axis=0, keepdims=True)
    y_ref[...] = y.reshape(TH // 2, 2, W, Cout).astype(y_ref.dtype)


def _bn_relu_pool_kernel(y_ref, s_ref, t_ref, o_ref):
    """Fused BatchNorm affine (hoisted scale/shift) + 2x2 max-pool + ReLU.

    (ReLU and max-pool commute, and the affine is applied pre-pool so negative gamma
    is handled exactly.)  Single full-tile load; no strided ref indexing.

    y_ref: (RT, 2, W, C) f32, s_ref/t_ref: (1, 1, C) f32, o_ref: (RT, W//2, C) bf16
    """
    RT, _, W, C = y_ref.shape
    W2 = W // 2
    z = y_ref[...] * s_ref[...] + t_ref[...]              # (RT, 2, W, C)
    z = jnp.maximum(z[:, 0, :, :], z[:, 1, :, :])          # row-pair max  -> (RT, W, C)
    z = z.reshape(RT, W2, 2, C)
    z = jnp.maximum(z[:, :, 0, :], z[:, :, 1, :])          # col-pair max  -> (RT, W2, C)
    o_ref[...] = jnp.maximum(z, 0.0).astype(o_ref.dtype)   # ReLU after pool (equivalent)


def _heads_kernel(x_ref, w_ref, b_ref, eps_ref, o_ref, *, L):
    """Fused [fc_mean | fc_logvar] matmul + reparameterization, packed (N, 3L) output."""
    y = jnp.dot(x_ref[...], w_ref[...], preferred_element_type=jnp.float32) + b_ref[...]
    mean = y[:, :L]
    logvar = y[:, L:]
    z = mean + jnp.exp(0.5 * logvar) * eps_ref[...]
    o_ref[...] = jnp.concatenate([y, z], axis=-1)          # [mean | logvar | z]


# ----------------------------- pallas_call wrappers -----------------------------

def conv_bias_stats(xi, wf, b, *, TH):
    MR, W, KKC = xi.shape
    Cout = wf.shape[1]
    assert MR % TH == 0 and TH % 2 == 0
    G = MR // TH
    return pl.pallas_call(
        _conv_bias_stats_kernel,
        out_shape=(jax.ShapeDtypeStruct((MR // 2, 2, W, Cout), jnp.float32),
                   jax.ShapeDtypeStruct((G, 2, Cout), jnp.float32)),
        grid=(G,),
        in_specs=[pl.BlockSpec((TH, W, KKC), lambda i: (i, 0, 0)),
                  pl.BlockSpec((KKC, Cout), lambda i: (0, 0)),
                  pl.BlockSpec((1, Cout), lambda i: (0, 0))],
        out_specs=(pl.BlockSpec((TH // 2, 2, W, Cout), lambda i: (i, 0, 0, 0)),
                   pl.BlockSpec((1, 2, Cout), lambda i: (i, 0, 0))),
        compiler_params=_COMPILER,
    )(xi, wf, b)


def bn_relu_pool(y, scale, shift, *, RT):
    MR2, _, W, C = y.shape
    assert MR2 % RT == 0 and W % 2 == 0
    W2 = W // 2
    G = MR2 // RT
    return pl.pallas_call(
        _bn_relu_pool_kernel,
        out_shape=jax.ShapeDtypeStruct((MR2, W2, C), jnp.bfloat16),
        grid=(G,),
        in_specs=[pl.BlockSpec((RT, 2, W, C), lambda i: (i, 0, 0, 0)),
                  pl.BlockSpec((1, 1, C), lambda i: (0, 0, 0)),
                  pl.BlockSpec((1, 1, C), lambda i: (0, 0, 0))],
        out_specs=pl.BlockSpec((RT, W2, C), lambda i: (i, 0, 0)),
        compiler_params=_COMPILER,
    )(y, scale, shift)


def heads(xc, w2, b2, eps, *, L):
    N, F = xc.shape
    ce = pl.CostEstimate(
        flops=2 * N * F * 2 * L + 8 * N * L,
        transcendentals=N * L,
        bytes_accessed=xc.size * 2 + w2.size * 2 + b2.size * 4 + eps.size * 4 + N * 3 * L * 4)
    out = pl.pallas_call(
        functools.partial(_heads_kernel, L=L),
        out_shape=jax.ShapeDtypeStruct((N, 3 * L), jnp.float32),
        cost_estimate=ce,
    )(xc, w2, b2, eps)
    return out[:, :L], out[:, L:2 * L], out[:, 2 * L:]


# ----------------------------- JAX glue (layout plumbing) -----------------------------

def _im2col_nhwc(a, K, pad):
    """(N, H, W, C) -> (N*H, W, K*K*C) im2col, column order (kh, kw, c)."""
    N, H, W, C = a.shape
    xp = jnp.pad(a, ((0, 0), (pad, pad), (pad, pad), (0, 0)))
    cols = [xp[:, kh:kh + H, kw:kw + W, :] for kh in range(K) for kw in range(K)]
    return jnp.concatenate(cols, axis=-1).reshape(N * H, W, K * K * C)


def _conv_bn_relu_pool_layer(a, w, b, g, beta, K, pad):
    N, H, W, Cin = a.shape
    Cout = w.shape[0]
    assert 2 * pad == K - 1 and H % 2 == 0 and W % 2 == 0

    xi = _im2col_nhwc(a, K, pad)                                          # bf16
    wf = jnp.transpose(w, (2, 3, 1, 0)).reshape(K * K * Cin, Cout).astype(jnp.bfloat16)

    MR = N * H
    TH = _pick_rows_tile(MR, 64)
    y, stats = conv_bias_stats(xi, wf, b.reshape(1, Cout), TH=TH)

    # BatchNorm (training mode): stats over N*H*W, biased variance; affine hoisted to a
    # single per-channel scale/shift consumed by the fused pool kernel.
    cnt = float(MR * W)
    mean = jnp.sum(stats[:, 0, :], axis=0) / cnt
    var = jnp.sum(stats[:, 1, :], axis=0) / cnt - mean * mean
    scale = g * lax.rsqrt(var + BN_EPS)
    shift = beta - mean * scale

    RT = _pick_tile(MR // 2, 64)
    p = bn_relu_pool(y, scale.reshape(1, 1, Cout), shift.reshape(1, 1, Cout), RT=RT)
    return p.reshape(N, H // 2, W // 2, Cout)                             # bf16 NHWC


def cvae_encoder_forward(x_nchw, condition, conv_params, wm, bm, wl, bl, eps):
    a = jnp.transpose(x_nchw, (0, 2, 3, 1)).astype(jnp.bfloat16)          # NHWC, bf16
    for (w, b, g, beta, K, pad) in conv_params:
        a = _conv_bn_relu_pool_layer(a, w, b, g, beta, K, pad)

    N = a.shape[0]
    flat = jnp.transpose(a, (0, 3, 1, 2)).reshape(N, -1)                  # torch.flatten(NCHW)
    xc = jnp.concatenate([flat, condition.astype(jnp.bfloat16)], axis=1)
    L = wm.shape[1]
    w_heads = jnp.concatenate([wm, wl], axis=1).astype(jnp.bfloat16)      # (F, 2L)
    b_heads = jnp.concatenate([bm, bl], axis=1)                           # (1, 2L)
    return heads(xc, w_heads, b_heads, eps, L=L)


# ----------------------------- pure-JAX reference -----------------------------

def reference_forward(x, cond, conv_params, wm, bm, wl, bl, eps):
    a = x
    for (w, b, g, beta, K, pad) in conv_params:
        a = lax.conv_general_dilated(
            a, w, window_strides=(1, 1), padding=((pad, pad), (pad, pad)),
            dimension_numbers=("NCHW", "OIHW", "NCHW")) + b[None, :, None, None]
        mu = jnp.mean(a, axis=(0, 2, 3), keepdims=True)
        var = jnp.mean((a - mu) ** 2, axis=(0, 2, 3), keepdims=True)
        a = (a - mu) * lax.rsqrt(var + BN_EPS) * g[None, :, None, None] + beta[None, :, None, None]
        a = jnp.maximum(a, 0.0)
        N_, C_, H_, W_ = a.shape
        a = jnp.max(a.reshape(N_, C_, H_ // 2, 2, W_ // 2, 2), axis=(3, 5))
    flat = a.reshape(a.shape[0], -1)
    xc = jnp.concatenate([flat, cond], axis=1)
    mean = xc @ wm + bm
    logvar = xc @ wl + bl
    z = mean + jnp.exp(0.5 * logvar) * eps
    return mean, logvar, z


# ----------------------------- main -----------------------------

if __name__ == "__main__":
    key = jax.random.PRNGKey(0)
    keys = jax.random.split(key, 20)

    N = 2
    latent_dim = 16
    condition_dim = 8
    input_shape = (3, 32, 32)          # small stand-in for the default (3, 128, 128)

    def nrm(k, shape, scale):
        return (scale * jax.random.normal(k, shape)).astype(jnp.float32)

    conv_defs = [(3, 64, 5, 2), (64, 64, 3, 1), (64, 32, 3, 1)]   # (Cin, Cout, K, pad)
    conv_params = []
    ki = 0
    for (cin, cout, K, pad) in conv_defs:
        w = nrm(keys[ki], (cout, cin, K, K), 1.0 / np.sqrt(cin * K * K)); ki += 1
        b = nrm(keys[ki], (cout,), 0.1); ki += 1
        g = 1.0 + nrm(keys[ki], (cout,), 0.1); ki += 1
        beta = nrm(keys[ki], (cout,), 0.1); ki += 1
        conv_params.append((w, b, g, beta, K, pad))

    flatten_dim = 32 * (input_shape[1] // 8) * (input_shape[2] // 8)   # 512
    fin = flatten_dim + condition_dim
    wm = nrm(keys[12], (fin, latent_dim), 1.0 / np.sqrt(fin))
    bm = nrm(keys[13], (1, latent_dim), 0.1)
    wl = nrm(keys[14], (fin, latent_dim), 1.0 / np.sqrt(fin))
    bl = nrm(keys[15], (1, latent_dim), 0.1)

    x = jax.random.normal(keys[16], (N,) + input_shape, jnp.float32)
    condition = jax.random.normal(keys[17], (N, condition_dim), jnp.float32)
    eps = jax.random.normal(keys[18], (N, latent_dim), jnp.float32)   # reparam noise

    mean, logvar, z = cvae_encoder_forward(x, condition, conv_params, wm, bm, wl, bl, eps)
    jax.block_until_ready((mean, logvar, z))

    rmean, rlogvar, rz = reference_forward(x, condition, conv_params, wm, bm, wl, bl, eps)
    # Tolerances account for bf16 MXU inputs (f32 accumulation) in every matmul along the
    # three-layer conv stack and the heads.
    np.testing.assert_allclose(np.asarray(mean), np.asarray(rmean), rtol=4e-2, atol=6e-2)
    np.testing.assert_allclose(np.asarray(logvar), np.asarray(rlogvar), rtol=4e-2, atol=6e-2)
    np.testing.assert_allclose(np.asarray(z), np.asarray(rz), rtol=4e-2, atol=6e-2)

    print("KERNEL_OK")
</pallas_src>

<mosaic_0001>
module attributes {stable_mosaic.version = 11 : i64} {
  func.func @_conv_bias_stats_kernel(%arg0: i32, %arg1: memref<32x32x75xbf16, #tpu.memory_space<vmem>>, %arg2: memref<75x64xbf16, #tpu.memory_space<vmem>>, %arg3: memref<1x64xf32, #tpu.memory_space<vmem>>, %arg4: memref<16x2x32x64xf32, #tpu.memory_space<vmem>>, %arg5: memref<1x2x64xf32, #tpu.memory_space<vmem>>) attributes {dimension_semantics = [#tpu.dimension_semantics<parallel>], iteration_bounds = array<i64: 2>, scalar_prefetch = 0 : i64, scratch_operands = 0 : i64, tpu.core_type = #tpu.core_type<tc>, window_params = [{transform_indices = @transform_0, window_bounds = array<i64: 32, 32, 75>}, {pipeline_mode = #tpu.pipeline_mode<synchronous>, transform_indices = @transform_1, window_bounds = array<i64: 75, 64>}, {pipeline_mode = #tpu.pipeline_mode<synchronous>, transform_indices = @transform_2, window_bounds = array<i64: 1, 64>}, {transform_indices = @transform_3, window_bounds = array<i64: 16, 2, 32, 64>}, {transform_indices = @transform_4, window_bounds = array<i64: 1, 2, 64>}]} {
    %c0 = arith.constant 0 : index
    %c0_0 = arith.constant 0 : index
    %c0_1 = arith.constant 0 : index
    %0 = vector.load %arg1[%c0, %c0_0, %c0_1] : memref<32x32x75xbf16, #tpu.memory_space<vmem>>, vector<32x32x75xbf16>
    %1 = vector.shape_cast %0 : vector<32x32x75xbf16> to vector<1024x75xbf16>
    %c0_2 = arith.constant 0 : index
    %c0_3 = arith.constant 0 : index
    %2 = vector.load %arg2[%c0_2, %c0_3] : memref<75x64xbf16, #tpu.memory_space<vmem>>, vector<75x64xbf16>
    %cst = arith.constant dense<0.000000e+00> : vector<1024x64xf32>
    %3 = tpu.matmul %1, %2, %cst {dimension_numbers = #tpu.dot_dimension_numbers<[1], [0], [0], [1], [0, 0, 1, 1], [], []>} : vector<1024x75xbf16>, vector<75x64xbf16>, vector<1024x64xf32> -> vector<1024x64xf32>
    %c0_4 = arith.constant 0 : index
    %c0_5 = arith.constant 0 : index
    %4 = vector.load %arg3[%c0_4, %c0_5] : memref<1x64xf32, #tpu.memory_space<vmem>>, vector<1x64xf32>
    %5 = vector.broadcast %4 : vector<1x64xf32> to vector<1024x64xf32>
    %6 = arith.addf %3, %5 : vector<1024x64xf32>
    %cst_6 = arith.constant dense<0.000000e+00> : vector<64xf32>
    %7 = vector.multi_reduction <add>, %6, %cst_6 [0] : vector<1024x64xf32> to vector<64xf32>
    %8 = vector.shape_cast %7 : vector<64xf32> to vector<1x64xf32>
    %c0_7 = arith.constant 0 : index
    %c0_8 = arith.constant 0 : index
    %c0_9 = arith.constant 0 : index
    %9 = vector.load %arg5[%c0_7, %c0_8, %c0_9] : memref<1x2x64xf32, #tpu.memory_space<vmem>>, vector<1x1x64xf32>
    %10 = vector.shape_cast %9 : vector<1x1x64xf32> to vector<1x64xf32>
    %11 = vector.shape_cast %8 : vector<1x64xf32> to vector<1x1x64xf32>
    tpu.vector_store %arg5[%c0_7, %c0_8, %c0_9], %11 {strides = array<i32>} : memref<1x2x64xf32, #tpu.memory_space<vmem>>, vector<1x1x64xf32>,
    %12 = arith.mulf %6, %6 : vector<1024x64xf32>
    %cst_10 = arith.constant dense<0.000000e+00> : vector<64xf32>
    %13 = vector.multi_reduction <add>, %12, %cst_10 [0] : vector<1024x64xf32> to vector<64xf32>
    %14 = vector.shape_cast %13 : vector<64xf32> to vector<1x64xf32>
    %c0_11 = arith.constant 0 : index
    %c1 = arith.constant 1 : index
    %c0_12 = arith.constant 0 : index
    %15 = vector.load %arg5[%c0_11, %c1, %c0_12] : memref<1x2x64xf32, #tpu.memory_space<vmem>>, vector<1x1x64xf32>
    %16 = vector.shape_cast %15 : vector<1x1x64xf32> to vector<1x64xf32>
    %17 = vector.shape_cast %14 : vector<1x64xf32> to vector<1x1x64xf32>
    tpu.vector_store %arg5[%c0_11, %c1, %c0_12], %17 {strides = array<i32>} : memref<1x2x64xf32, #tpu.memory_space<vmem>>, vector<1x1x64xf32>,
    %18 = vector.shape_cast %6 : vector<1024x64xf32> to vector<16x2x32x64xf32>
    %c0_13 = arith.constant 0 : index
    %c0_14 = arith.constant 0 : index
    %c0_15 = arith.constant 0 : index
    %c0_16 = arith.constant 0 : index
    %19 = vector.load %arg4[%c0_13, %c0_14, %c0_15, %c0_16] : memref<16x2x32x64xf32, #tpu.memory_space<vmem>>, vector<16x2x32x64xf32>
    tpu.vector_store %arg4[%c0_13, %c0_14, %c0_15, %c0_16], %18 {strides = array<i32>} : memref<16x2x32x64xf32, #tpu.memory_space<vmem>>, vector<16x2x32x64xf32>,
    return
  }
  func.func @transform_0(%arg0: i32) -> (i32, i32, i32) {
    %c0_i32 = arith.constant 0 : i32
    %c0_i32_0 = arith.constant 0 : i32
    %c0_i32_1 = arith.constant 0 : i32
    return %arg0, %c0_i32, %c0_i32_0 : i32, i32, i32
  }
  func.func @transform_1(%arg0: i32) -> (i32, i32) {
    %c0_i32 = arith.constant 0 : i32
    %c0_i32_0 = arith.constant 0 : i32
    %c0_i32_1 = arith.constant 0 : i32
    return %c0_i32, %c0_i32_0 : i32, i32
  }
  func.func @transform_2(%arg0: i32) -> (i32, i32) {
    %c0_i32 = arith.constant 0 : i32
    %c0_i32_0 = arith.constant 0 : i32
    %c0_i32_1 = arith.constant 0 : i32
    return %c0_i32, %c0_i32_0 : i32, i32
  }
  func.func @transform_3(%arg0: i32) -> (i32, i32, i32, i32) {
    %c0_i32 = arith.constant 0 : i32
    %c0_i32_0 = arith.constant 0 : i32
    %c0_i32_1 = arith.constant 0 : i32
    %c0_i32_2 = arith.constant 0 : i32
    return %arg0, %c0_i32, %c0_i32_0, %c0_i32_1 : i32, i32, i32, i32
  }
  func.func @transform_4(%arg0: i32) -> (i32, i32, i32) {
    %c0_i32 = arith.constant 0 : i32
    %c0_i32_0 = arith.constant 0 : i32
    %c0_i32_1 = arith.constant 0 : i32
    return %arg0, %c0_i32, %c0_i32_0 : i32, i32, i32
  }
}

</mosaic_0001>

<bundles_post_ra>
// kernel: tpu_custom_call.1
= control target key start
LH: loop header
LB: loop body
LE: loop exit
PB: predicated region body
PF: predicated region fallthrough
CT: control target
= control target key end

     0   :  { %10 = vsyncpa [#allocation3], 0  ;;  %s4597_s0 = inlined_call_operand.hbm [shape: bf16[64,32,75], index: 0, kind: input, shape index: {}]   ;;  %s4598_s1 = inlined_call_operand.vmem [shape: bf16[75,64], index: 1, kind: input, shape index: {}]   ;;  %s4599_s2 = inlined_call_operand.vmem [shape: f32[1,64], index: 2, kind: input, shape index: {}]   ;;  %s4600_s3 = inlined_call_operand.hbm [shape: f32[32,2,32,64], index: 3, kind: output, shape index: {0}]   ;;  %s4601_s4 = inlined_call_operand.hbm [shape: f32[2,2,64], index: 4, kind: output, shape index: {1}]  }
   0x1   :  { %12 = vsyncpa [#allocation3 + $0x1], 0 }
   0x2   :  { %13 = vsyncpa [#allocation4], 0 }
   0x3   :  { %15 = vsyncpa [#allocation4 + $0x1], 0 }
   0x4   :  { %16 = vsyncpa [#allocation7], 0 }
   0x5   :  { %18 = vsyncpa [#allocation7 + $0x1], 0  ;;  %s3053_s15 = smov 0   ;;  %s3055_s16 = smov 0  }
   0x6   :  { %s3057_s17 = smov 0   ;;  %s3059_s18 = smov 0  }
   0x7 LB: > { %s3074_s19 = sadd.s32 4294967295, %s3018_s18   ;;  %s2390_s20 = sadd.s32 4294967294, %s3018_s18   ;;  %s3018_s18 = sphi %s3059_s18, %s4658_s18   ;;  %s3014_s17 = sphi %s3057_s17, %s4657_s17   ;;  %s3010_s16 = sphi %s3055_s16, %s4656_s16   ;;  %s3006_s15 = sphi %s3053_s15, %s4655_s15  }
   0x8   : > { %s3078_s21 = sadd.s32 1, %s3018_s18   ;;  %s31_s22 = sadd.s32 1, %s3014_s17 }
   0x9   : > { %s28_s23 = ssub.s32 %s3018_s18, %s3078_s21  ;;  %p38_p0 = scmp.ne.s32.totalorder %s3014_s17, %s3010_s16 }
   0xa   : > { %p29_p1 = scmp.eq.s32.totalorder %s28_s23, 0  ;;  %p39_p2 = scmp.eq.s32.totalorder %s3018_s18, 0 }
   0xb   : > { %p44_p3 = scmp.ne.s32.totalorder %s3010_s16, %s3006_s15  ;;  %p45_p4 = scmp.eq.s32.totalorder %s3074_s19, 0 }
   0xc   : > { %s3090_s24 = scalar_select %p29_p1, %s3014_s17, %s31_s22  }
   0xd   : > { %p3092_p5 = por %p39_p2, %p38_p0  ;;  %p3096_p6 = por %p45_p4, %p44_p3 }
   0xe   : > { %p110_p7 = scmp.eq.s32.totalorder %s3074_s19, 1  ;;  %p116_p8 = scmp.eq.s32.totalorder %s2390_s20, 1 }
   0xf   : > { %p2781_p10 = scmp.lt.s32.totalorder %s3018_s18, 2  ;;  %s168_s29 = sand.u32 1, %s3014_s17  }
  0x10   : > { %p3103_p11 = por %p110_p7, %p38_p0  ;;  %p3107_p12 = por %p116_p8, %p44_p3 }
  0x11   : > { %s2544_s30 = sshll.u32 %s3018_s18, 13  ;;  %s2393_s5 = sshll.u32 %s168_s29, 9 }
  0x12   : > { %s4627_s27 = scalar_select %p3103_p11, 1, 0 }
  0x13   : > { %s4628_s28 = scalar_select %p3107_p12, 1, 0 }
  0x14   : > { %s3116_s8 = scalar_lea.hbm %s4597_s0, %s2544_s30  ;;  %s172_s9 = scalar_lea.vmem [#allocation2], %s2393_s5 }
  0x15   : > { %s180_s10 = sshll.u32 %s172_s9, 4  ;;  %p3120_p13 = pnand %p2781_p10, %p3092_p5  ;;  %s3124_s10 = int_to_ptr.vmem [resolvable:$true] %s180_s10 }
  0x16   : > { %s3126_s12 = scalar_lea.sflag [#allocation3], %s168_s29  ;;  %s2890_s13 = scalar_lea.hbm %s3116_s8, 8192 }
  0x17   : > { %p2891_p0 = scmp.ne.s32.totalorder %s3116_s8, %s2890_s13  ;;  %p2892_p1 = pneg %p3120_p13 }
  0x18   : > { %s2895_s22 = scalar_lea.hbm %s4597_s0, 16384  ;;  %p2896_p4 = scmp.lt.u32.totalorder %s3116_s8, %s4597_s0 }
  0x19   : > { %p2893_p2 = pnand %p2892_p1, %p2891_p0  ;;  %p2897_p5 = scmp.lt.u32.totalorder %s2895_s22, %s2890_s13 }
  0x1a   : > { %p2899_p8 = scmp.lt.u32.totalorder %s2890_s13, %s3116_s8 }
  0x1b   : > { %p2894_p3 = pneg %p2893_p2  ;;  %p2898_p7 = por %p2897_p5, %p2896_p4 }
  0x1d   : > { %p2900_p10 = por %p2899_p8, %p2898_p7 }
  0x1f   : > { %p2901_p9 = pnand %p2900_p10, %p2894_p3 }
  0x21   : > { %2904 = shalt.err (!%p2901_p9)
}
  0x22   : > { %s2905_s29 = scalar_lea.vmem %s3124_s10, 8192  ;;  %s3020_s30 = smov [#allocation2]  }
  0x23   : > { %p2906_p0 = scmp.ne.s32.totalorder %s3124_s10, %s2905_s29  ;;  %s2910_s5 = sshll.u32 %s3020_s30, 4  ;;  %s2911_s5 = int_to_ptr.vmem [resolvable:$false] %s2910_s5 }
  0x24   : > { %s2912_s6 = scalar_lea.vmem %s2911_s5, 16384  ;;  %p2913_p11 = scmp.lt.s32.totalorder %s3124_s10, %s2911_s5 }
  0x25   : > { %p2908_p2 = pnand %p2906_p0, %p2892_p1  ;;  %p2914_p4 = scmp.lt.s32.totalorder %s2912_s6, %s2905_s29 }
  0x27   : > { %p2909_p12 = pneg %p2908_p2  ;;  %p2915_p5 = por %p2914_p4, %p2913_p11 }
  0x29   : > { %p2916_p7 = pnand %p2915_p5, %p2909_p12 }
  0x2b   : > { %2919 = shalt.err (!%p2916_p7)
}
  0x2c   : > { %s3021_s7 = smov 64   ;;  %s3022_s9 = smov 4  }
  0x2d   : > { %2773 = dma.hbm_to_vmem [thread:$0]  (!%p3120_p13), %s3116_s8, 8192, %s3124_s10, %s3126_s12, %s3021_s7, %s3021_s7, %s3022_s9  }
  0x2e   : > { %p2397_p9 = scmp.ge.s32.totalorder %s3018_s18, 1  ;;  %p188_p1 = scmp.lt.s32.totalorder %s3018_s18, 3 }
  0x30   : > { %p189_p3 = pnand %p2397_p9, %p188_p1 }
  0x32   : > { %192 = sbr.rel (%p189_p3) target bundleno = 595 (0x253), region = 32 }
  0x39   : > { %s3157_s13 = sand.u32 1, %s3010_s16  }
  0x3a   : > { %s2398_s14 = sshll.u32 %s3157_s13, 9  ;;  %s195_s20 = scalar_lea.sflag [#allocation3], %s3157_s13 }
  0x3b   : > { %s3161_s22 = scalar_lea.vmem [#allocation2], %s2398_s14 }
  0x3c   : > { %2993 = dma.done.wait (%p3096_p6), %s195_s20, 8192  }
  0x3d   : > { %2995 = vsyncadd (%p3096_p6), %s195_s20, 4294959104  ;;  %v2820_v0 = vld [vmem:[%s4598_s1] sm:$0xff]   ;;  %v2821_v1 = vld [vmem:[%s4598_s1 + $0x8] sm:$0xff]   ;;  %vm918_vm0 = vcmask 1044480   ;;  %vm725_vm1 = vcmask 613376   ;;  %vm919_vm2 = vcmask 1045504  }
  0x3e   : > { %2616 = vmatprep.subr.bf16.mxu0 %v2820_v0  ;;  %2754 = vmatprep.subr.bf16.mxu1 %v2820_v0  ;;  %v2822_v2 = vld [vmem:[%s4598_s1 + $0x10] sm:$0xff]   ;;  %v2825_v3 = vld [vmem:[%s3161_s22] sm:$0xff]   ;;  %v3023_v4 = vmov 65535   ;;  %v2823_v6 = vld [vmem:[%s4598_s1 + $0x18] sm:$0xff]   ;;  %s2399_s6 = sshll.u32 %s3157_s13, 10  ;;  %vm1470_vm3 = vcmask 523264  }
  0x3f   : > { %2617 = vmatpush3.bf16.msra.mxu0 %v2820_v0  ;;  %2759 = vmatpush3.bf16.msra.mxu1 %v2820_v0  ;;  %v920_v5 = vsel %vm918_vm0, 4294967295, %v3023_v4  ;;  %v2824_v7 = vld [vmem:[%s4598_s1 + $0x20] sm:$0x3f]   ;;  %v2826_v10 = vld [vmem:[%s3161_s22 + $0x8] sm:$0xff]   ;;  %v2827_v11 = vld [vmem:[%s3161_s22 + $0x10] sm:$0xff]   ;;  %s3318_s14 = scalar_lea.vmem [#allocation5], %s2399_s6 }
  0x40   : > { %2618 = vmatprep.subr.bf16.mxu0 %v2821_v1  ;;  %2755 = vmatprep.subr.bf16.mxu1 %v2821_v1  ;;  %v921_v8 = vsel %vm919_vm2, %v920_v5, 0  ;;  %v2828_v12 = vld [vmem:[%s3161_s22 + $0x18] sm:$0xff]   ;;  %v2829_v13 = vld [vmem:[%s3161_s22 + $0x20] sm:$0xff]   ;;  %v2830_v14 = vld [vmem:[%s3161_s22 + $0x28] sm:$0xff]   ;;  %s2546_s8 = sshll.u32 %s3074_s19, 14  ;;  %s2272_s10 = sshll.u32 %s3318_s14, 4  ;;  %s4292_s10 = int_to_ptr.vmem [resolvable:$true] %s2272_s10 }
  0x41   : > { %2626 = vmatprep.mubr.msk.bf16.mxu0 %vm725_vm1, %v2825_v3  ;;  %v923_v9 = vand.u32 %v2824_v7, %v921_v8  ;;  %v2831_v15 = vld [vmem:[%s3161_s22 + $0x30] sm:$0xff]   ;;  %v2857_v16 = vld [vmem:[%s3161_s22 + $0x100] sm:$0xff]   ;;  %v2858_v17 = vld [vmem:[%s3161_s22 + $0x108] sm:$0xff]   ;;  %s4290_s23 = scalar_lea.hbm %s4600_s3, %s2546_s8  ;;  %s2253_s25 = scalar_lea.sflag [#allocation4], %s3157_s13 }
  0x42   : > { %2690 = vmatprep.mubr.msk.bf16.mxu1 %vm725_vm1, %v2857_v16  ;;  %v2859_v18 = vld [vmem:[%s3161_s22 + $0x110] sm:$0xff]   ;;  %v2832_v19 = vld [vmem:[%s3161_s22 + $0x38] sm:$0xff]   ;;  %v2833_v20 = vld [vmem:[%s3161_s22 + $0x40] sm:$0xff]   ;;  %s2920_s26 = scalar_lea.vmem %s4292_s10, 16384  ;;  %p4649_p11 = scmp.ne.s32.totalorder %s4627_s27, 0 }
  0x43   : > { %2619 = vmatpush3.bf16.msra.mxu0 %v2821_v1  ;;  %2760 = vmatpush3.bf16.msra.mxu1 %v2821_v1  ;;  %v2860_v21 = vld [vmem:[%s3161_s22 + $0x118] sm:$0xff]   ;;  %v2861_v22 = vld [vmem:[%s3161_s22 + $0x120] sm:$0xff]   ;;  %v2834_v23 = vld [vmem:[%s3161_s22 + $0x48] sm:$0xff]   ;;  %p2921_p6 = scmp.ne.s32.totalorder %s4292_s10, %s2920_s26  ;;  %s3024_s29 = smov [#allocation5]  }
  0x44   : > { %2620 = vmatprep.subr.bf16.mxu0 %v2822_v2  ;;  %2756 = vmatprep.subr.bf16.mxu1 %v2822_v2  ;;  %v2835_v24 = vld [vmem:[%s3161_s22 + $0x50] sm:$0xff]   ;;  %v2862_v25 = vld [vmem:[%s3161_s22 + $0x128] sm:$0xff]   ;;  %v2836_v27 = vld [vmem:[%s3161_s22 + $0x58] sm:$0xff]   ;;  %s2924_s30 = sshll.u32 %s3024_s29, 4  ;;  %s2925_s30 = int_to_ptr.vmem [resolvable:$false] %s2924_s30 }
  0x45   : > { %v2863_v26 = vld [vmem:[%s3161_s22 + $0x130] sm:$0xff]   ;;  %v2837_v28 = vld [vmem:[%s3161_s22 + $0x60] sm:$0xff]   ;;  %v2864_v29 = vld [vmem:[%s3161_s22 + $0x138] sm:$0xff]   ;;  %p2922_p12 = pnand %p2921_p6, %p4649_p11  ;;  %s2926_s5 = scalar_lea.vmem %s2925_s30, 32768 }
  0x46   : > { %v2865_v30 = vld [vmem:[%s3161_s22 + $0x140] sm:$0xff]   ;;  %v2838_v31 = vld [vmem:[%s3161_s22 + $0x68] sm:$0xff]   ;;  %v2839_v32 = vld [vmem:[%s3161_s22 + $0x70] sm:$0xff]   ;;  %p2927_p8 = scmp.lt.s32.totalorder %s4292_s10, %s2925_s30  ;;  %p2928_p10 = scmp.lt.s32.totalorder %s2926_s5, %s2920_s26 }
  0x47   : > { %2621 = vmatpush3.bf16.msra.mxu0 %v2822_v2  ;;  %2761 = vmatpush3.bf16.msra.mxu1 %v2822_v2  ;;  %v2866_v33 = vld [vmem:[%s3161_s22 + $0x148] sm:$0xff]   ;;  %v2867_v34 = vld [vmem:[%s3161_s22 + $0x150] sm:$0xff]   ;;  %v2840_v35 = vld [vmem:[%s3161_s22 + $0x78] sm:$0xff]   ;;  %p2923_p13 = pneg %p2922_p12 }
  0x48   : > { %2622 = vmatprep.subr.bf16.mxu0 %v2823_v6  ;;  %2757 = vmatprep.subr.bf16.mxu1 %v2823_v6  ;;  %v2841_v36 = vld [vmem:[%s3161_s22 + $0x80] sm:$0xff]   ;;  %v2868_v37 = vld [vmem:[%s3161_s22 + $0x158] sm:$0xff]   ;;  %v2842_v39 = vld [vmem:[%s3161_s22 + $0x88] sm:$0xff]   ;;  %p2929_p0 = por %p2928_p10, %p2927_p8 }
  0x49   : > { %v2869_v38 = vld [vmem:[%s3161_s22 + $0x160] sm:$0xff]   ;;  %v2843_v40 = vld [vmem:[%s3161_s22 + $0x90] sm:$0xff]   ;;  %v2870_v41 = vld [vmem:[%s3161_s22 + $0x168] sm:$0xff]  }
  0x4a   : > { %v2871_v42 = vld [vmem:[%s3161_s22 + $0x170] sm:$0xff]   ;;  %v2844_v43 = vld [vmem:[%s3161_s22 + $0x98] sm:$0xff]   ;;  %v2845_v44 = vld [vmem:[%s3161_s22 + $0xa0] sm:$0xff]   ;;  %p2930_p2 = pnand %p2929_p0, %p2923_p13 }
  0x4b   : > { %2623 = vmatpush3.bf16.msra.mxu0 %v2823_v6  ;;  %2762 = vmatpush3.bf16.msra.mxu1 %v2823_v6  ;;  %v2872_v45 = vld [vmem:[%s3161_s22 + $0x178] sm:$0xff]   ;;  %v2873_v46 = vld [vmem:[%s3161_s22 + $0x180] sm:$0xff]   ;;  %v2846_v47 = vld [vmem:[%s3161_s22 + $0xa8] sm:$0xff]  }
  0x4c   : > { %2624 = vmatprep.subr.bf16.mxu0 %v923_v9  ;;  %2758 = vmatprep.subr.bf16.mxu1 %v923_v9  ;;  %v2847_v48 = vld [vmem:[%s3161_s22 + $0xb0] sm:$0xff]   ;;  %v2874_v49 = vld [vmem:[%s3161_s22 + $0x188] sm:$0xff]   ;;  %v2848_v51 = vld [vmem:[%s3161_s22 + $0xb8] sm:$0xff]  }
  0x4d   : > { %v2875_v50 = vld [vmem:[%s3161_s22 + $0x190] sm:$0xff]   ;;  %v2849_v52 = vld [vmem:[%s3161_s22 + $0xc0] sm:$0xff]   ;;  %v2876_v53 = vld [vmem:[%s3161_s22 + $0x198] sm:$0xff]  }
  0x4e   : > { %v2877_v54 = vld [vmem:[%s3161_s22 + $0x1a0] sm:$0xff]   ;;  %v2850_v55 = vld [vmem:[%s3161_s22 + $0xc8] sm:$0xff]   ;;  %v2851_v56 = vld [vmem:[%s3161_s22 + $0xd0] sm:$0xff]  }
  0x4f   : > { %2625 = vmatpush3.bf16.msra.mxu0 %v923_v9  ;;  %2763 = vmatpush3.bf16.msra.mxu1 %v923_v9  ;;  %v2878_v57 = vld [vmem:[%s3161_s22 + $0x1a8] sm:$0xff]   ;;  %v2879_v58 = vld [vmem:[%s3161_s22 + $0x1b0] sm:$0xff]   ;;  %v2852_v59 = vld [vmem:[%s3161_s22 + $0xd8] sm:$0xff]  }
  0x50   : > { %v2853_v60 = vld [vmem:[%s3161_s22 + $0xe0] sm:$0xff]   ;;  %v2880_v61 = vld [vmem:[%s3161_s22 + $0x1b8] sm:$0xff]   ;;  %v2854_v63 = vld [vmem:[%s3161_s22 + $0xe8] sm:$0xff]  }
  0x51   : > { %v2881_v62 = vld [vmem:[%s3161_s22 + $0x1c0] sm:$0xff]   ;;  %v2855_v0 = vld [vmem:[%s3161_s22 + $0xf0] sm:$0xff]   ;;  %v2882_v1 = vld [vmem:[%s3161_s22 + $0x1c8] sm:$0xff]  }
  0x52   : > { %2627 = vmatmul.mubr.msk.bf16.vlgmr.msra.gmra.mrb[0].mxu0 %vm725_vm1, %v2826_v10  ;;  %2691 = vmatmul.mubr.msk.bf16.vlgmr.msra.gmra.mrb[0].mxu1 %vm725_vm1, %v2858_v17  ;;  %v2883_v2 = vld [vmem:[%s3161_s22 + $0x1d0] sm:$0xff]   ;;  %v2856_v3 = vld [vmem:[%s3161_s22 + $0xf8] sm:$0xff]   ;;  %v2885_v5 = vld [vmem:[%s3161_s22 + $0x1e0] sm:$0xff]  }
  0x53   : > { %2630 = vmatprep.mubr.msk.bf16.mxu0 %vm725_vm1, %v2827_v11  ;;  %2694 = vmatprep.mubr.msk.bf16.mxu1 %vm725_vm1, %v2859_v18  ;;  %v2884_v4 = vld [vmem:[%s3161_s22 + $0x1d8] sm:$0xff]   ;;  %v2886_v6 = vld [vmem:[%s3161_s22 + $0x1e8] sm:$0xff]   ;;  %v2887_v7 = vld [vmem:[%s3161_s22 + $0x1f0] sm:$0xff]  }
  0x54   : > { %v2888_v8 = vld [vmem:[%s3161_s22 + $0x1f8] sm:$0xff]   ;;  %v3314_v9 = vld [vmem:[%s4599_s2] ss:$0 sm:$0xff] }
  0x5a   : > { %2631 = vmatmul.mubr.msk.bf16.gmra.mrb[4].mxu0 %vm725_vm1, %v2828_v12  ;;  %2695 = vmatmul.mubr.msk.bf16.gmra.mrb[4].mxu1 %vm725_vm1, %v2860_v21 }
  0x5b   : > { %2634 = vmatprep.mubr.msk.bf16.mxu0 %vm725_vm1, %v2829_v13  ;;  %2698 = vmatprep.mubr.msk.bf16.mxu1 %vm725_vm1, %v2861_v22 }
  0x62   : > { %2635 = vmatmul.mubr.msk.bf16.gmra.mrb[8].mxu0 %vm725_vm1, %v2830_v14  ;;  %2699 = vmatmul.mubr.msk.bf16.gmra.mrb[8].mxu1 %vm725_vm1, %v2862_v25 }
  0x63   : > { %2638 = vmatprep.mubr.msk.bf16.mxu0 %vm725_vm1, %v2831_v15  ;;  %2702 = vmatprep.mubr.msk.bf16.mxu1 %vm725_vm1, %v2863_v26 }
  0x6a   : > { %2639 = vmatmul.mubr.msk.bf16.gmra.mrb[12].mxu0 %vm725_vm1, %v2832_v19  ;;  %2703 = vmatmul.mubr.msk.bf16.gmra.mrb[12].mxu1 %vm725_vm1, %v2864_v29 }
  0x6b   : > { %2642 = vmatprep.mubr.msk.bf16.mxu0 %vm725_vm1, %v2833_v20  ;;  %2706 = vmatprep.mubr.msk.bf16.mxu1 %vm725_vm1, %v2865_v30 }
  0x72   : > { %2643 = vmatmul.mubr.msk.bf16.gmra.mrb[16].mxu0 %vm725_vm1, %v2834_v23  ;;  %2707 = vmatmul.mubr.msk.bf16.gmra.mrb[16].mxu1 %vm725_vm1, %v2866_v33 }
  0x73   : > { %2646 = vmatprep.mubr.msk.bf16.mxu0 %vm725_vm1, %v2835_v24  ;;  %2710 = vmatprep.mubr.msk.bf16.mxu1 %vm725_vm1, %v2867_v34 }
  0x7a   : > { %2647 = vmatmul.mubr.msk.bf16.gmra.mrb[20].mxu0 %vm725_vm1, %v2836_v27  ;;  %2711 = vmatmul.mubr.msk.bf16.gmra.mrb[20].mxu1 %vm725_vm1, %v2868_v37 }
  0x7b   : > { %2650 = vmatprep.mubr.msk.bf16.mxu0 %vm725_vm1, %v2837_v28  ;;  %2714 = vmatprep.mubr.msk.bf16.mxu1 %vm725_vm1, %v2869_v38 }
  0x82   : > { %2651 = vmatmul.mubr.msk.bf16.gmra.mrb[24].mxu0 %vm725_vm1, %v2838_v31  ;;  %2715 = vmatmul.mubr.msk.bf16.gmra.mrb[24].mxu1 %vm725_vm1, %v2870_v41 }
  0x83   : > { %2654 = vmatprep.mubr.msk.bf16.mxu0 %vm725_vm1, %v2839_v32  ;;  %2718 = vmatprep.mubr.msk.bf16.mxu1 %vm725_vm1, %v2871_v42 }
  0x8a   : > { %2655 = vmatmul.mubr.msk.bf16.gmra.mrb[28].mxu0 %vm725_vm1, %v2840_v35  ;;  %2719 = vmatmul.mubr.msk.bf16.gmra.mrb[28].mxu1 %vm725_vm1, %v2872_v45 }
  0x8b   : > { %2658 = vmatprep.mubr.msk.bf16.mxu0 %vm725_vm1, %v2841_v36  ;;  %2722 = vmatprep.mubr.msk.bf16.mxu1 %vm725_vm1, %v2873_v46 }
  0x92   : > { %2659 = vmatmul.mubr.msk.bf16.gmra.mrb[32].mxu0 %vm725_vm1, %v2842_v39  ;;  %2723 = vmatmul.mubr.msk.bf16.gmra.mrb[32].mxu1 %vm725_vm1, %v2874_v49 }
  0x93   : > { %2662 = vmatprep.mubr.msk.bf16.mxu0 %vm725_vm1, %v2843_v40  ;;  %2726 = vmatprep.mubr.msk.bf16.mxu1 %vm725_vm1, %v2875_v50 }
  0x9a   : > { %2663 = vmatmul.mubr.msk.bf16.gmra.mrb[36].mxu0 %vm725_vm1, %v2844_v43  ;;  %2727 = vmatmul.mubr.msk.bf16.gmra.mrb[36].mxu1 %vm725_vm1, %v2876_v53 }
  0x9b   : > { %2666 = vmatprep.mubr.msk.bf16.mxu0 %vm725_vm1, %v2845_v44  ;;  %2730 = vmatprep.mubr.msk.bf16.mxu1 %vm725_vm1, %v2877_v54 }
  0xa2   : > { %2667 = vmatmul.mubr.msk.bf16.gmra.mrb[40].mxu0 %vm725_vm1, %v2846_v47  ;;  %2731 = vmatmul.mubr.msk.bf16.gmra.mrb[40].mxu1 %vm725_vm1, %v2878_v57 }
  0xa3   : > { %2670 = vmatprep.mubr.msk.bf16.mxu0 %vm725_vm1, %v2847_v48  ;;  %2734 = vmatprep.mubr.msk.bf16.mxu1 %vm725_vm1, %v2879_v58 }
  0xaa   : > { %2671 = vmatmul.mubr.msk.bf16.gmra.mrb[44].mxu0 %vm725_vm1, %v2848_v51  ;;  %2735 = vmatmul.mubr.msk.bf16.gmra.mrb[44].mxu1 %vm725_vm1, %v2880_v61 }
  0xab   : > { %2674 = vmatprep.mubr.msk.bf16.mxu0 %vm725_vm1, %v2849_v52  ;;  %2738 = vmatprep.mubr.msk.bf16.mxu1 %vm725_vm1, %v2881_v62 }
  0xb2   : > { %2675 = vmatmul.mubr.msk.bf16.gmra.mrb[48].mxu0 %vm725_vm1, %v2850_v55  ;;  %2739 = vmatmul.mubr.msk.bf16.gmra.mrb[48].mxu1 %vm725_vm1, %v2882_v1 }
  0xb3   : > { %2678 = vmatprep.mubr.msk.bf16.mxu0 %vm725_vm1, %v2851_v56  ;;  %2742 = vmatprep.mubr.msk.bf16.mxu1 %vm725_vm1, %v2883_v2 }
  0xba   : > { %2679 = vmatmul.mubr.msk.bf16.gmra.mrb[52].mxu0 %vm725_vm1, %v2852_v59  ;;  %2743 = vmatmul.mubr.msk.bf16.gmra.mrb[52].mxu1 %vm725_vm1, %v2884_v4 }
  0xbb   : > { %2682 = vmatprep.mubr.msk.bf16.mxu0 %vm725_vm1, %v2853_v60  ;;  %2746 = vmatprep.mubr.msk.bf16.mxu1 %vm725_vm1, %v2885_v5 }
  0xc2   : > { %2683 = vmatmul.mubr.msk.bf16.gmra.mrb[56].mxu0 %vm725_vm1, %v2854_v63  ;;  %2747 = vmatmul.mubr.msk.bf16.gmra.mrb[56].mxu1 %vm725_vm1, %v2886_v6 }
  0xc3   : > { %2686 = vmatprep.mubr.msk.bf16.mxu0 %vm725_vm1, %v2855_v0  ;;  %2750 = vmatprep.mubr.msk.bf16.mxu1 %vm725_vm1, %v2887_v7 }
  0xca   : > { %2687 = vmatmul.mubr.msk.bf16.gmra.mrb[60].mxu0 %vm725_vm1, %v2856_v3  ;;  %2751 = vmatmul.mubr.msk.bf16.gmra.mrb[60].mxu1 %vm725_vm1, %v2888_v8 }
 0x125   : > { %v2628_v10 = vpop.f32.mrb[0].mxu0  ;;  %v2692_v0 = vpop.f32.mrb[0].mxu1 }
 0x126   : > { %v968_v11 = vadd.f32 %v2628_v10, %v3314_v9  ;;  %v959_v12 = vpop.f32.mrb[1].mxu0  ;;  %v1215_v5 = vpop.f32.mrb[1].mxu1 }
 0x127   : > { %v960_v13 = vadd.f32 %v3314_v9, %v959_v12  ;;  %v2629_v14 = vpop.f32.mrb[2].mxu0 }
 0x128   : > { %2126 = vst.msk [vmem:[%s3318_s14 + $0x10] sm:$0xff] %vm1470_vm3, %v968_v11  ;;  %v971_v15 = vadd.f32 %v2629_v14, %v3314_v9  ;;  %v962_v16 = vpop.f32.mrb[3].mxu0  ;;  %v1736_v19 = vmul.f32 %v968_v11, %v968_v11  ;;  %v1474_v25 = vsel %vm1470_vm3, %v968_v11, 0.0  ;;  %v2693_v11 = vpop.f32.mrb[2].mxu1 }
 0x129   : > { %v1734_v17 = vmul.f32 %v960_v13, %v960_v13  ;;  %2124 = vst.msk [vmem:[%s3318_s14] sm:$0xff] %vm1470_vm3, %v960_v13  ;;  %v963_v18 = vadd.f32 %v3314_v9, %v962_v16  ;;  %v1471_v20 = vsel %vm1470_vm3, %v960_v13, 0.0 }
 0x12a   : > { %2127 = vst.msk [vmem:[%s3318_s14 + $0x18] sm:$0xff] %vm1470_vm3, %v971_v15  ;;  %v1737_v23 = vmul.f32 %v971_v15, %v971_v15  ;;  %v1865_v33 = vsel %vm1470_vm3, %v1736_v19, 0.0  ;;  %v1476_v34 = vsel %vm1470_vm3, %v971_v15, 0.0  ;;  %v1218_v15 = vpop.f32.mrb[3].mxu1 }
 0x12b   : > { %v1472_v21 = vsel %vm1470_vm3, %v963_v18, 0.0  ;;  %v1735_v22 = vmul.f32 %v963_v18, %v963_v18  ;;  %2125 = vst.msk [vmem:[%s3318_s14 + $0x8] sm:$0xff] %vm1470_vm3, %v963_v18  ;;  %v1862_v26 = vsel %vm1470_vm3, %v1734_v17, 0.0 }
 0x12c   : > { %v1473_v24 = vadd.f32 %v1472_v21, %v1471_v20  ;;  %v1867_v37 = vsel %vm1470_vm3, %v1737_v23, 0.0  ;;  %v3378_v23 = vadd.f32 %v3314_v9, %v1215_v5 }
 0x12d   : > { %v1863_v27 = vsel %vm1470_vm3, %v1735_v22, 0.0  ;;  %v2632_v28 = vpop.f32.mrb[4].mxu0  ;;  %v3375_v22 = vadd.f32 %v2692_v0, %v3314_v9 }
 0x12e   : > { %v1475_v29 = vadd.f32 %v1474_v25, %v1473_v24  ;;  %v1864_v30 = vadd.f32 %v1863_v27, %v1862_v26  ;;  %v984_v31 = vadd.f32 %v2632_v28, %v3314_v9  ;;  %v975_v32 = vpop.f32.mrb[5].mxu0  ;;  %v3382_v27 = vadd.f32 %v2693_v11, %v3314_v9  ;;  %2188 = vst.msk [vmem:[%s3318_s14 + $0x200] sm:$0xff] %vm1470_vm3, %v3378_v23 }
 0x12f   : > { %v976_v35 = vadd.f32 %v3314_v9, %v975_v32  ;;  %v2633_v36 = vpop.f32.mrb[6].mxu0  ;;  %v3385_v28 = vadd.f32 %v3314_v9, %v1218_v15  ;;  %2190 = vst.msk [vmem:[%s3318_s14 + $0x210] sm:$0xff] %vm1470_vm3, %v3375_v22 }
 0x130   : > { %v1477_v38 = vadd.f32 %v1476_v34, %v1475_v29  ;;  %v1866_v39 = vadd.f32 %v1865_v33, %v1864_v30  ;;  %2130 = vst.msk [vmem:[%s3318_s14 + $0x30] sm:$0xff] %vm1470_vm3, %v984_v31  ;;  %v978_v40 = vpop.f32.mrb[7].mxu0  ;;  %v987_v43 = vadd.f32 %v2633_v36, %v3314_v9  ;;  %v1740_v49 = vmul.f32 %v984_v31, %v984_v31 }
 0x131   : > { %v1478_v41 = vsel %vm1470_vm3, %v976_v35, 0.0  ;;  %v1738_v42 = vmul.f32 %v976_v35, %v976_v35  ;;  %2128 = vst.msk [vmem:[%s3318_s14 + $0x20] sm:$0xff] %vm1470_vm3, %v976_v35  ;;  %v979_v44 = vadd.f32 %v3314_v9, %v978_v40  ;;  %v1482_v53 = vsel %vm1470_vm3, %v984_v31, 0.0  ;;  %2191 = vst.msk [vmem:[%s3318_s14 + $0x218] sm:$0xff] %vm1470_vm3, %v3382_v27 }
 0x132   : > { %v1868_v45 = vadd.f32 %v1867_v37, %v1866_v39  ;;  %v1479_v46 = vadd.f32 %v1478_v41, %v1477_v38  ;;  %2131 = vst.msk [vmem:[%s3318_s14 + $0x38] sm:$0xff] %vm1470_vm3, %v987_v43  ;;  %v1741_v55 = vmul.f32 %v987_v43, %v987_v43  ;;  %v1484_v60 = vsel %vm1470_vm3, %v987_v43, 0.0  ;;  %2189 = vst.msk [vmem:[%s3318_s14 + $0x208] sm:$0xff] %vm1470_vm3, %v3385_v28  ;;  %v2696_v37 = vpop.f32.mrb[4].mxu1 }
 0x133   : > { %v1869_v47 = vsel %vm1470_vm3, %v1738_v42, 0.0  ;;  %v1480_v48 = vsel %vm1470_vm3, %v979_v44, 0.0  ;;  %2129 = vst.msk [vmem:[%s3318_s14 + $0x28] sm:$0xff] %vm1470_vm3, %v979_v44  ;;  %v1739_v52 = vmul.f32 %v979_v44, %v979_v44  ;;  %v1873_v1 = vsel %vm1470_vm3, %v1740_v49, 0.0  ;;  %v1231_v42 = vpop.f32.mrb[5].mxu1 }
 0x134   : > { %v1870_v50 = vadd.f32 %v1869_v47, %v1868_v45  ;;  %v1481_v51 = vadd.f32 %v1480_v48, %v1479_v46  ;;  %v1875_v12 = vsel %vm1470_vm3, %v1741_v55, 0.0  ;;  %v2697_v47 = vpop.f32.mrb[6].mxu1  ;;  %v3423_v5 = vadd.f32 %v2696_v37, %v3314_v9 }
 0x135   : > { %v2636_v54 = vpop.f32.mrb[8].mxu0  ;;  %v1871_v57 = vsel %vm1470_vm3, %v1739_v52, 0.0 }
 0x136   : > { %v1483_v56 = vadd.f32 %v1482_v53, %v1481_v51  ;;  %v1000_v58 = vadd.f32 %v2636_v54, %v3314_v9  ;;  %v991_v59 = vpop.f32.mrb[9].mxu0  ;;  %v1872_v61 = vadd.f32 %v1871_v57, %v1870_v50  ;;  %v1234_v50 = vpop.f32.mrb[7].mxu1  ;;  %2194 = vst.msk [vmem:[%s3318_s14 + $0x230] sm:$0xff] %vm1470_vm3, %v3423_v5 }
 0x137   : > { %v992_v62 = vadd.f32 %v3314_v9, %v991_v59  ;;  %v2637_v63 = vpop.f32.mrb[10].mxu0 }
 0x138   : > { %v1485_v2 = vadd.f32 %v1484_v60, %v1483_v56  ;;  %2134 = vst.msk [vmem:[%s3318_s14 + $0x50] sm:$0xff] %vm1470_vm3, %v1000_v58  ;;  %v1003_v3 = vadd.f32 %v2637_v63, %v3314_v9  ;;  %v994_v4 = vpop.f32.mrb[11].mxu0  ;;  %v1874_v6 = vadd.f32 %v1873_v1, %v1872_v61  ;;  %v1490_v13 = vsel %vm1470_vm3, %v1000_v58, 0.0 }
 0x139   : > { %v1486_v7 = vsel %vm1470_vm3, %v992_v62, 0.0  ;;  %v1742_v8 = vmul.f32 %v992_v62, %v992_v62  ;;  %2132 = vst.msk [vmem:[%s3318_s14 + $0x40] sm:$0xff] %vm1470_vm3, %v992_v62  ;;  %v995_v10 = vadd.f32 %v3314_v9, %v994_v4  ;;  %v1744_v20 = vmul.f32 %v1000_v58, %v1000_v58 }
 0x13a   : > { %v1487_v14 = vadd.f32 %v1486_v7, %v1485_v2  ;;  %2135 = vst.msk [vmem:[%s3318_s14 + $0x58] sm:$0xff] %vm1470_vm3, %v1003_v3  ;;  %v1876_v16 = vadd.f32 %v1875_v12, %v1874_v6  ;;  %v1745_v29 = vmul.f32 %v1003_v3, %v1003_v3  ;;  %v1492_v33 = vsel %vm1470_vm3, %v1003_v3, 0.0  ;;  %v3425_v6 = vpop.f32.mrb[8].mxu1 }
 0x13b   : > { %v1877_v17 = vsel %vm1470_vm3, %v1742_v8, 0.0  ;;  %v1488_v18 = vsel %vm1470_vm3, %v995_v10, 0.0  ;;  %v1743_v19 = vmul.f32 %v995_v10, %v995_v10  ;;  %2133 = vst.msk [vmem:[%s3318_s14 + $0x48] sm:$0xff] %vm1470_vm3, %v995_v10  ;;  %v1881_v38 = vsel %vm1470_vm3, %v1744_v20, 0.0  ;;  %v3431_v12 = vpop.f32.mrb[9].mxu1 }
 0x13c   : > { %v1489_v21 = vadd.f32 %v1488_v18, %v1487_v14  ;;  %v1878_v24 = vadd.f32 %v1877_v17, %v1876_v16  ;;  %v1883_v48 = vsel %vm1470_vm3, %v1745_v29, 0.0  ;;  %v3440_v17 = vpop.f32.mrb[10].mxu1 }
 0x13d   : > { %v1879_v25 = vsel %vm1470_vm3, %v1743_v19, 0.0  ;;  %v2640_v26 = vpop.f32.mrb[12].mxu0  ;;  %v3445_v20 = vpop.f32.mrb[11].mxu1 }
 0x13e   : > { %v1491_v30 = vadd.f32 %v1490_v13, %v1489_v21  ;;  %v1016_v31 = vadd.f32 %v2640_v26, %v3314_v9  ;;  %v1007_v32 = vpop.f32.mrb[13].mxu0  ;;  %v1880_v34 = vadd.f32 %v1879_v25, %v1878_v24 }
 0x13f   : > { %v1008_v35 = vadd.f32 %v3314_v9, %v1007_v32  ;;  %v2641_v36 = vpop.f32.mrb[14].mxu0 }
 0x140   : > { %v1493_v39 = vadd.f32 %v1492_v33, %v1491_v30  ;;  %2138 = vst.msk [vmem:[%s3318_s14 + $0x70] sm:$0xff] %vm1470_vm3, %v1016_v31  ;;  %v1019_v40 = vadd.f32 %v2641_v36, %v3314_v9  ;;  %v1010_v41 = vpop.f32.mrb[15].mxu0  ;;  %v1882_v43 = vadd.f32 %v1881_v38, %v1880_v34  ;;  %v1748_v55 = vmul.f32 %v1016_v31, %v1016_v31 }
 0x141   : > { %v1494_v44 = vsel %vm1470_vm3, %v1008_v35, 0.0  ;;  %v1746_v45 = vmul.f32 %v1008_v35, %v1008_v35  ;;  %2136 = vst.msk [vmem:[%s3318_s14 + $0x60] sm:$0xff] %vm1470_vm3, %v1008_v35  ;;  %v1011_v46 = vadd.f32 %v3314_v9, %v1010_v41  ;;  %v1498_v57 = vsel %vm1470_vm3, %v1016_v31, 0.0 }
 0x142   : > { %v1495_v49 = vadd.f32 %v1494_v44, %v1493_v39  ;;  %2139 = vst.msk [vmem:[%s3318_s14 + $0x78] sm:$0xff] %vm1470_vm3, %v1019_v40  ;;  %v1884_v51 = vadd.f32 %v1883_v48, %v1882_v43  ;;  %v1749_v61 = vmul.f32 %v1019_v40, %v1019_v40  ;;  %v1500_v1 = vsel %vm1470_vm3, %v1019_v40, 0.0 }
 0x143   : > { %v1885_v52 = vsel %vm1470_vm3, %v1746_v45, 0.0  ;;  %v1496_v53 = vsel %vm1470_vm3, %v1011_v46, 0.0  ;;  %v1747_v54 = vmul.f32 %v1011_v46, %v1011_v46  ;;  %2137 = vst.msk [vmem:[%s3318_s14 + $0x68] sm:$0xff] %vm1470_vm3, %v1011_v46  ;;  %v1889_v7 = vsel %vm1470_vm3, %v1748_v55, 0.0  ;;  %v3468_v46 = vpop.f32.mrb[12].mxu1 }
 0x144   : > { %v1497_v56 = vadd.f32 %v1496_v53, %v1495_v49  ;;  %v1886_v58 = vadd.f32 %v1885_v52, %v1884_v51  ;;  %v1891_v18 = vsel %vm1470_vm3, %v1749_v61, 0.0  ;;  %v3454_v36 = vadd.f32 %v3314_v9, %v1231_v42  ;;  %v3480_v51 = vpop.f32.mrb[13].mxu1 }
 0x145   : > { %v1887_v59 = vsel %vm1470_vm3, %v1747_v54, 0.0  ;;  %v2644_v60 = vpop.f32.mrb[16].mxu0  ;;  %v3458_v40 = vadd.f32 %v2697_v47, %v3314_v9  ;;  %v3461_v41 = vadd.f32 %v3314_v9, %v1234_v50 }
 0x146   : > { %v1499_v62 = vadd.f32 %v1498_v57, %v1497_v56  ;;  %v1032_v63 = vadd.f32 %v2644_v60, %v3314_v9  ;;  %v1023_v0 = vpop.f32.mrb[17].mxu0  ;;  %v1888_v2 = vadd.f32 %v1887_v59, %v1886_v58  ;;  %2192 = vst.msk [vmem:[%s3318_s14 + $0x220] sm:$0xff] %vm1470_vm3, %v3454_v36  ;;  %v3486_v56 = vpop.f32.mrb[14].mxu1 }
 0x147   : > { %v1024_v3 = vadd.f32 %v3314_v9, %v1023_v0  ;;  %v2645_v4 = vpop.f32.mrb[18].mxu0  ;;  %2195 = vst.msk [vmem:[%s3318_s14 + $0x238] sm:$0xff] %vm1470_vm3, %v3458_v40  ;;  %2193 = vst.msk [vmem:[%s3318_s14 + $0x228] sm:$0xff] %vm1470_vm3, %v3461_v41  ;;  %v3491_v59 = vpop.f32.mrb[15].mxu1 }
 0x148   : > { %v1501_v8 = vadd.f32 %v1500_v1, %v1499_v62  ;;  %2142 = vst.msk [vmem:[%s3318_s14 + $0x90] sm:$0xff] %vm1470_vm3, %v1032_v63  ;;  %v1035_v10 = vadd.f32 %v2645_v4, %v3314_v9  ;;  %v1026_v11 = vpop.f32.mrb[19].mxu0  ;;  %v1890_v13 = vadd.f32 %v1889_v7, %v1888_v2  ;;  %v1506_v29 = vsel %vm1470_vm3, %v1032_v63, 0.0 }
 0x149   : > { %v1502_v14 = vsel %vm1470_vm3, %v1024_v3, 0.0  ;;  %v1750_v15 = vmul.f32 %v1024_v3, %v1024_v3  ;;  %2140 = vst.msk [vmem:[%s3318_s14 + $0x80] sm:$0xff] %vm1470_vm3, %v1024_v3  ;;  %v1027_v16 = vadd.f32 %v3314_v9, %v1026_v11  ;;  %v1752_v30 = vmul.f32 %v1032_v63, %v1032_v63 }
 0x14a   : > { %v1503_v19 = vadd.f32 %v1502_v14, %v1501_v8  ;;  %2143 = vst.msk [vmem:[%s3318_s14 + $0x98] sm:$0xff] %vm1470_vm3, %v1035_v10  ;;  %v1892_v21 = vadd.f32 %v1891_v18, %v1890_v13  ;;  %v1753_v33 = vmul.f32 %v1035_v10, %v1035_v10  ;;  %v1508_v43 = vsel %vm1470_vm3, %v1035_v10, 0.0 }
 0x14b   : > { %v1893_v24 = vsel %vm1470_vm3, %v1750_v15, 0.0  ;;  %v1504_v25 = vsel %vm1470_vm3, %v1027_v16, 0.0  ;;  %v1751_v26 = vmul.f32 %v1027_v16, %v1027_v16  ;;  %2141 = vst.msk [vmem:[%s3318_s14 + $0x88] sm:$0xff] %vm1470_vm3, %v1027_v16  ;;  %v1897_v48 = vsel %vm1470_vm3, %v1752_v30, 0.0 }
 0x14c   : > { %v1505_v31 = vadd.f32 %v1504_v25, %v1503_v19  ;;  %v1894_v32 = vadd.f32 %v1893_v24, %v1892_v21  ;;  %v1899_v57 = vsel %vm1470_vm3, %v1753_v33, 0.0  ;;  %v3504_v19 = vadd.f32 %v3425_v6, %v3314_v9  ;;  %v3506_v21 = vpop.f32.mrb[16].mxu1 }
 0x14d   : > { %v1895_v34 = vsel %vm1470_vm3, %v1751_v26, 0.0  ;;  %v2648_v35 = vpop.f32.mrb[20].mxu0  ;;  %v3512_v30 = vpop.f32.mrb[17].mxu1 }
 0x14e   : > { %v1507_v37 = vadd.f32 %v1506_v29, %v1505_v31  ;;  %v1048_v38 = vadd.f32 %v2648_v35, %v3314_v9  ;;  %v1039_v39 = vpop.f32.mrb[21].mxu0  ;;  %v1896_v44 = vadd.f32 %v1895_v34, %v1894_v32  ;;  %2198 = vst.msk [vmem:[%s3318_s14 + $0x250] sm:$0xff] %vm1470_vm3, %v3504_v19  ;;  %v3521_v34 = vpop.f32.mrb[18].mxu1 }
 0x14f   : > { %v1040_v45 = vadd.f32 %v3314_v9, %v1039_v39  ;;  %v2649_v42 = vpop.f32.mrb[22].mxu0 }
 0x150   : > { %v1509_v47 = vadd.f32 %v1508_v43, %v1507_v37  ;;  %2146 = vst.msk [vmem:[%s3318_s14 + $0xb0] sm:$0xff] %vm1470_vm3, %v1048_v38  ;;  %v1051_v49 = vadd.f32 %v2649_v42, %v3314_v9  ;;  %v1042_v50 = vpop.f32.mrb[23].mxu0  ;;  %v1898_v52 = vadd.f32 %v1897_v48, %v1896_v44  ;;  %v1756_v0 = vmul.f32 %v1048_v38, %v1048_v38 }
 0x151   : > { %v1510_v53 = vsel %vm1470_vm3, %v1040_v45, 0.0  ;;  %v1754_v54 = vmul.f32 %v1040_v45, %v1040_v45  ;;  %2144 = vst.msk [vmem:[%s3318_s14 + $0xa0] sm:$0xff] %vm1470_vm3, %v1040_v45  ;;  %v1043_v55 = vadd.f32 %v3314_v9, %v1042_v50  ;;  %v1514_v2 = vsel %vm1470_vm3, %v1048_v38, 0.0  ;;  %v3526_v38 = vpop.f32.mrb[19].mxu1 }
 0x152   : > { %v1511_v58 = vadd.f32 %v1510_v53, %v1509_v47  ;;  %2147 = vst.msk [vmem:[%s3318_s14 + $0xb8] sm:$0xff] %vm1470_vm3, %v1051_v49  ;;  %v1900_v60 = vadd.f32 %v1899_v57, %v1898_v52  ;;  %v1757_v8 = vmul.f32 %v1051_v49, %v1051_v49  ;;  %v1516_v14 = vsel %vm1470_vm3, %v1051_v49, 0.0 }
 0x153   : > { %v1901_v61 = vsel %vm1470_vm3, %v1754_v54, 0.0  ;;  %v1512_v62 = vsel %vm1470_vm3, %v1043_v55, 0.0  ;;  %v1755_v63 = vmul.f32 %v1043_v55, %v1043_v55  ;;  %2145 = vst.msk [vmem:[%s3318_s14 + $0xa8] sm:$0xff] %vm1470_vm3, %v1043_v55  ;;  %v1905_v24 = vsel %vm1470_vm3, %v1756_v0, 0.0 }
 0x154   : > { %v1513_v1 = vadd.f32 %v1512_v62, %v1511_v58  ;;  %v1902_v3 = vadd.f32 %v1901_v61, %v1900_v60  ;;  %v1907_v35 = vsel %vm1470_vm3, %v1757_v8, 0.0  ;;  %v3536_v54 = vadd.f32 %v3314_v9, %v3431_v12 }
 0x155   : > { %v1903_v4 = vsel %vm1470_vm3, %v1755_v63, 0.0  ;;  %v2652_v7 = vpop.f32.mrb[24].mxu0  ;;  %v3541_v60 = vadd.f32 %v3440_v17, %v3314_v9  ;;  %v3545_v61 = vadd.f32 %v3314_v9, %v3445_v20 }
 0x156   : > { %v1515_v10 = vadd.f32 %v1514_v2, %v1513_v1  ;;  %v1064_v11 = vadd.f32 %v2652_v7, %v3314_v9  ;;  %v1055_v13 = vpop.f32.mrb[25].mxu0  ;;  %v1904_v15 = vadd.f32 %v1903_v4, %v1902_v3  ;;  %2196 = vst.msk [vmem:[%s3318_s14 + $0x240] sm:$0xff] %vm1470_vm3, %v3536_v54  ;;  %v3552_v1 = vpop.f32.mrb[20].mxu1 }
 0x157   : > { %v1056_v16 = vadd.f32 %v3314_v9, %v1055_v13  ;;  %v2653_v18 = vpop.f32.mrb[26].mxu0  ;;  %2199 = vst.msk [vmem:[%s3318_s14 + $0x258] sm:$0xff] %vm1470_vm3, %v3541_v60  ;;  %2197 = vst.msk [vmem:[%s3318_s14 + $0x248] sm:$0xff] %vm1470_vm3, %v3545_v61  ;;  %v3564_v4 = vpop.f32.mrb[21].mxu1 }
 0x158   : > { %v1517_v25 = vadd.f32 %v1516_v14, %v1515_v10  ;;  %2150 = vst.msk [vmem:[%s3318_s14 + $0xd0] sm:$0xff] %vm1470_vm3, %v1064_v11  ;;  %v1067_v26 = vadd.f32 %v2653_v18, %v3314_v9  ;;  %v1058_v29 = vpop.f32.mrb[27].mxu0  ;;  %v1906_v31 = vadd.f32 %v1905_v24, %v1904_v15  ;;  %v1522_v42 = vsel %vm1470_vm3, %v1064_v11, 0.0  ;;  %v3570_v13 = vpop.f32.mrb[22].mxu1 }
 0x159   : > { %v1518_v32 = vsel %vm1470_vm3, %v1056_v16, 0.0  ;;  %v1758_v33 = vmul.f32 %v1056_v16, %v1056_v16  ;;  %2148 = vst.msk [vmem:[%s3318_s14 + $0xc0] sm:$0xff] %vm1470_vm3, %v1056_v16  ;;  %v1059_v6 = vadd.f32 %v3314_v9, %v1058_v29  ;;  %v1760_v48 = vmul.f32 %v1064_v11, %v1064_v11  ;;  %v3575_v16 = vpop.f32.mrb[23].mxu1 }
 0x15a   : > { %v1519_v37 = vadd.f32 %v1518_v32, %v1517_v25  ;;  %2151 = vst.msk [vmem:[%s3318_s14 + $0xd8] sm:$0xff] %vm1470_vm3, %v1067_v26  ;;  %v1908_v39 = vadd.f32 %v1907_v35, %v1906_v31  ;;  %v1761_v50 = vmul.f32 %v1067_v26, %v1067_v26  ;;  %v1524_v62 = vsel %vm1470_vm3, %v1067_v26, 0.0 }
 0x15b   : > { %v1909_v43 = vsel %vm1470_vm3, %v1758_v33, 0.0  ;;  %v1520_v44 = vsel %vm1470_vm3, %v1059_v6, 0.0  ;;  %v1759_v45 = vmul.f32 %v1059_v6, %v1059_v6  ;;  %2149 = vst.msk [vmem:[%s3318_s14 + $0xc8] sm:$0xff] %vm1470_vm3, %v1059_v6  ;;  %v1913_v2 = vsel %vm1470_vm3, %v1760_v48, 0.0 }
 0x15c   : > { %v1521_v47 = vadd.f32 %v1520_v44, %v1519_v37  ;;  %v1910_v49 = vadd.f32 %v1909_v43, %v1908_v39  ;;  %v1915_v14 = vsel %vm1470_vm3, %v1761_v50, 0.0  ;;  %v3590_v50 = vpop.f32.mrb[24].mxu1 }
 0x15d   : > { %v1911_v52 = vsel %vm1470_vm3, %v1759_v45, 0.0  ;;  %v2656_v53 = vpop.f32.mrb[28].mxu0 }
 0x15e   : > { %v1523_v55 = vadd.f32 %v1522_v42, %v1521_v47  ;;  %v1080_v57 = vadd.f32 %v2656_v53, %v3314_v9  ;;  %v1071_v58 = vpop.f32.mrb[29].mxu0  ;;  %v1912_v63 = vadd.f32 %v1911_v52, %v1910_v49  ;;  %v3588_v49 = vadd.f32 %v3468_v46, %v3314_v9 }
 0x15f   : > { %v1072_v12 = vadd.f32 %v3314_v9, %v1071_v58  ;;  %v2657_v0 = vpop.f32.mrb[30].mxu0  ;;  %v3596_v58 = vpop.f32.mrb[25].mxu1 }
 0x160   : > { %v1525_v17 = vadd.f32 %v1524_v62, %v1523_v55  ;;  %2154 = vst.msk [vmem:[%s3318_s14 + $0xf0] sm:$0xff] %vm1470_vm3, %v1080_v57  ;;  %v1083_v20 = vadd.f32 %v2657_v0, %v3314_v9  ;;  %v1074_v3 = vpop.f32.mrb[31].mxu0  ;;  %v1914_v7 = vadd.f32 %v1913_v2, %v1912_v63  ;;  %v1764_v29 = vmul.f32 %v1080_v57, %v1080_v57  ;;  %v3605_v0 = vpop.f32.mrb[26].mxu1 }
 0x161   : > { %v1526_v8 = vsel %vm1470_vm3, %v1072_v12, 0.0  ;;  %v1762_v10 = vmul.f32 %v1072_v12, %v1072_v12  ;;  %2152 = vst.msk [vmem:[%s3318_s14 + $0xe0] sm:$0xff] %vm1470_vm3, %v1072_v12  ;;  %v1075_v11 = vadd.f32 %v3314_v9, %v1074_v3  ;;  %v1530_v32 = vsel %vm1470_vm3, %v1080_v57, 0.0  ;;  %2202 = vst.msk [vmem:[%s3318_s14 + $0x270] sm:$0xff] %vm1470_vm3, %v3588_v49 }
 0x162   : > { %v1527_v15 = vadd.f32 %v1526_v8, %v1525_v17  ;;  %2155 = vst.msk [vmem:[%s3318_s14 + $0xf8] sm:$0xff] %vm1470_vm3, %v1083_v20  ;;  %v1916_v18 = vadd.f32 %v1915_v14, %v1914_v7  ;;  %v1765_v37 = vmul.f32 %v1083_v20, %v1083_v20  ;;  %v1532_v45 = vsel %vm1470_vm3, %v1083_v20, 0.0  ;;  %v3610_v20 = vpop.f32.mrb[27].mxu1 }
 0x163   : > { %v1917_v24 = vsel %vm1470_vm3, %v1762_v10, 0.0  ;;  %v1528_v25 = vsel %vm1470_vm3, %v1075_v11, 0.0  ;;  %v1763_v26 = vmul.f32 %v1075_v11, %v1075_v11  ;;  %2153 = vst.msk [vmem:[%s3318_s14 + $0xe8] sm:$0xff] %vm1470_vm3, %v1075_v11  ;;  %v1921_v52 = vsel %vm1470_vm3, %v1764_v29, 0.0 }
 0x164   : > { %v1529_v31 = vadd.f32 %v1528_v25, %v1527_v15  ;;  %v1918_v33 = vadd.f32 %v1917_v24, %v1916_v18  ;;  %v1923_v2 = vsel %vm1470_vm3, %v1765_v37, 0.0  ;;  %v3620_v29 = vadd.f32 %v3314_v9, %v3480_v51 }
 0x165   : > { %v1919_v6 = vsel %vm1470_vm3, %v1763_v26, 0.0  ;;  %v2660_v35 = vpop.f32.mrb[32].mxu0 }
 0x166   : > { %v1531_v39 = vadd.f32 %v1530_v32, %v1529_v31  ;;  %v1096_v43 = vadd.f32 %v2660_v35, %v3314_v9  ;;  %v1087_v44 = vpop.f32.mrb[33].mxu0  ;;  %v1920_v42 = vadd.f32 %v1919_v6, %v1918_v33  ;;  %v3625_v6 = vadd.f32 %v3486_v56, %v3314_v9  ;;  %2200 = vst.msk [vmem:[%s3318_s14 + $0x260] sm:$0xff] %vm1470_vm3, %v3620_v29 }
 0x167   : > { %v1088_v48 = vadd.f32 %v3314_v9, %v1087_v44  ;;  %v2661_v47 = vpop.f32.mrb[34].mxu0  ;;  %v3629_v35 = vadd.f32 %v3314_v9, %v3491_v59  ;;  %v3636_v44 = vpop.f32.mrb[28].mxu1 }
 0x168   : > { %v1533_v53 = vadd.f32 %v1532_v45, %v1531_v39  ;;  %2158 = vst.msk [vmem:[%s3318_s14 + $0x110] sm:$0xff] %vm1470_vm3, %v1096_v43  ;;  %v1099_v55 = vadd.f32 %v2661_v47, %v3314_v9  ;;  %v1090_v57 = vpop.f32.mrb[35].mxu0  ;;  %v1922_v62 = vadd.f32 %v1921_v52, %v1920_v42  ;;  %v1538_v11 = vsel %vm1470_vm3, %v1096_v43, 0.0  ;;  %2203 = vst.msk [vmem:[%s3318_s14 + $0x278] sm:$0xff] %vm1470_vm3, %v3625_v6 }
 0x169   : > { %v1534_v63 = vsel %vm1470_vm3, %v1088_v48, 0.0  ;;  %v1766_v12 = vmul.f32 %v1088_v48, %v1088_v48  ;;  %2156 = vst.msk [vmem:[%s3318_s14 + $0x100] sm:$0xff] %vm1470_vm3, %v1088_v48  ;;  %v1091_v46 = vadd.f32 %v3314_v9, %v1090_v57  ;;  %v1768_v14 = vmul.f32 %v1096_v43, %v1096_v43  ;;  %2201 = vst.msk [vmem:[%s3318_s14 + $0x268] sm:$0xff] %vm1470_vm3, %v3629_v35  ;;  %v3648_v48 = vpop.f32.mrb[29].mxu1 }
 0x16a   : > { %v1535_v17 = vadd.f32 %v1534_v63, %v1533_v53  ;;  %2159 = vst.msk [vmem:[%s3318_s14 + $0x118] sm:$0xff] %vm1470_vm3, %v1099_v55  ;;  %v1924_v3 = vadd.f32 %v1923_v2, %v1922_v62  ;;  %v1769_v24 = vmul.f32 %v1099_v55, %v1099_v55  ;;  %v1540_v37 = vsel %vm1470_vm3, %v1099_v55, 0.0  ;;  %v3654_v57 = vpop.f32.mrb[30].mxu1 }
 0x16b   : > { %v1925_v7 = vsel %vm1470_vm3, %v1766_v12, 0.0  ;;  %v1536_v8 = vsel %vm1470_vm3, %v1091_v46, 0.0  ;;  %v1767_v10 = vmul.f32 %v1091_v46, %v1091_v46  ;;  %2157 = vst.msk [vmem:[%s3318_s14 + $0x108] sm:$0xff] %vm1470_vm3, %v1091_v46  ;;  %v1929_v45 = vsel %vm1470_vm3, %v1768_v14, 0.0  ;;  %v3659_v12 = vpop.f32.mrb[31].mxu1 }
 0x16c   : > { %v1537_v15 = vadd.f32 %v1536_v8, %v1535_v17  ;;  %v1926_v18 = vadd.f32 %v1925_v7, %v1924_v3  ;;  %v1931_v62 = vsel %vm1470_vm3, %v1769_v24, 0.0 }
 0x16d   : > { %v1927_v25 = vsel %vm1470_vm3, %v1767_v10, 0.0  ;;  %v2664_v26 = vpop.f32.mrb[36].mxu0 }
 0x16e   : > { %v1539_v31 = vadd.f32 %v1538_v11, %v1537_v15  ;;  %v1112_v32 = vadd.f32 %v2664_v26, %v3314_v9  ;;  %v1103_v33 = vpop.f32.mrb[37].mxu0  ;;  %v1928_v39 = vadd.f32 %v1927_v25, %v1926_v18 }
 0x16f   : > { %v1104_v51 = vadd.f32 %v3314_v9, %v1103_v33  ;;  %v2665_v43 = vpop.f32.mrb[38].mxu0 }
 0x170   : > { %v1541_v56 = vadd.f32 %v1540_v37, %v1539_v31  ;;  %2162 = vst.msk [vmem:[%s3318_s14 + $0x130] sm:$0xff] %vm1470_vm3, %v1112_v32  ;;  %v1115_v59 = vadd.f32 %v2665_v43, %v3314_v9  ;;  %v1106_v42 = vpop.f32.mrb[39].mxu0  ;;  %v1930_v47 = vadd.f32 %v1929_v45, %v1928_v39  ;;  %v1772_v7 = vmul.f32 %v1112_v32, %v1112_v32 }
 0x171   : > { %v1542_v52 = vsel %vm1470_vm3, %v1104_v51, 0.0  ;;  %v1770_v53 = vmul.f32 %v1104_v51, %v1104_v51  ;;  %2160 = vst.msk [vmem:[%s3318_s14 + $0x120] sm:$0xff] %vm1470_vm3, %v1104_v51  ;;  %v1107_v55 = vadd.f32 %v3314_v9, %v1106_v42  ;;  %v1546_v10 = vsel %vm1470_vm3, %v1112_v32, 0.0  ;;  %v3674_v51 = vpop.f32.mrb[32].mxu1 }
 0x172   : > { %v1543_v63 = vadd.f32 %v1542_v52, %v1541_v56  ;;  %2163 = vst.msk [vmem:[%s3318_s14 + $0x138] sm:$0xff] %vm1470_vm3, %v1115_v59  ;;  %v1932_v46 = vadd.f32 %v1931_v62, %v1930_v47  ;;  %v1773_v18 = vmul.f32 %v1115_v59, %v1115_v59  ;;  %v1548_v31 = vsel %vm1470_vm3, %v1115_v59, 0.0  ;;  %v3680_v42 = vpop.f32.mrb[33].mxu1 }
 0x173   : > { %v1933_v2 = vsel %vm1470_vm3, %v1770_v53, 0.0  ;;  %v1544_v17 = vsel %vm1470_vm3, %v1107_v55, 0.0  ;;  %v1771_v3 = vmul.f32 %v1107_v55, %v1107_v55  ;;  %2161 = vst.msk [vmem:[%s3318_s14 + $0x128] sm:$0xff] %vm1470_vm3, %v1107_v55  ;;  %v3672_v32 = vadd.f32 %v3506_v21, %v3314_v9  ;;  %v3689_v55 = vpop.f32.mrb[34].mxu1 }
 0x174   : > { %v1545_v8 = vadd.f32 %v1544_v17, %v1543_v63  ;;  %v1934_v11 = vadd.f32 %v1933_v2, %v1932_v46  ;;  %v1937_v43 = vsel %vm1470_vm3, %v1772_v7, 0.0  ;;  %v1939_v62 = vsel %vm1470_vm3, %v1773_v18, 0.0  ;;  %v3694_v46 = vpop.f32.mrb[35].mxu1 }
 0x175   : > { %v1935_v14 = vsel %vm1470_vm3, %v1771_v3, 0.0  ;;  %v2668_v15 = vpop.f32.mrb[40].mxu0  ;;  %4630 = vst [vmem:[#allocation11_spill] sm:$0xff] %v3672_v32  ;;  %2206 = vst.msk [vmem:[%s3318_s14 + $0x290] sm:$0xff] %vm1470_vm3, %v3672_v32 }
 0x176   : > { %v1547_v24 = vadd.f32 %v1546_v10, %v1545_v8  ;;  %v1128_v25 = vadd.f32 %v2668_v15, %v3314_v9  ;;  %v1119_v26 = vpop.f32.mrb[41].mxu0  ;;  %v1936_v33 = vadd.f32 %v1935_v14, %v1934_v11 }
 0x177   : > { %v1120_v37 = vadd.f32 %v3314_v9, %v1119_v26  ;;  %v2669_v39 = vpop.f32.mrb[42].mxu0  ;;  %v3704_v26 = vadd.f32 %v3314_v9, %v3512_v30 }
 0x178   : > { %v1549_v45 = vadd.f32 %v1548_v31, %v1547_v24  ;;  %2166 = vst.msk [vmem:[%s3318_s14 + $0x150] sm:$0xff] %vm1470_vm3, %v1128_v25  ;;  %v1131_v56 = vadd.f32 %v2669_v39, %v3314_v9  ;;  %v1122_v59 = vpop.f32.mrb[43].mxu0  ;;  %v1938_v47 = vadd.f32 %v1937_v43, %v1936_v33  ;;  %v1554_v8 = vsel %vm1470_vm3, %v1128_v25, 0.0 }
 0x179   : > { %v1550_v52 = vsel %vm1470_vm3, %v1120_v37, 0.0  ;;  %v1774_v53 = vmul.f32 %v1120_v37, %v1120_v37  ;;  %2164 = vst.msk [vmem:[%s3318_s14 + $0x140] sm:$0xff] %vm1470_vm3, %v1120_v37  ;;  %v1123_v21 = vadd.f32 %v3314_v9, %v1122_v59  ;;  %v1776_v10 = vmul.f32 %v1128_v25, %v1128_v25  ;;  %2204 = vst.msk [vmem:[%s3318_s14 + $0x280] sm:$0xff] %vm1470_vm3, %v3704_v26 }
 0x17a   : > { %v1551_v63 = vadd.f32 %v1550_v52, %v1549_v45  ;;  %2167 = vst.msk [vmem:[%s3318_s14 + $0x158] sm:$0xff] %vm1470_vm3, %v1131_v56  ;;  %v1940_v2 = vadd.f32 %v1939_v62, %v1938_v47  ;;  %v1777_v15 = vmul.f32 %v1131_v56, %v1131_v56  ;;  %v3709_v25 = vadd.f32 %v3521_v34, %v3314_v9  ;;  %v3720_v47 = vpop.f32.mrb[36].mxu1 }
 0x17b   : > { %v1941_v17 = vsel %vm1470_vm3, %v1774_v53, 0.0  ;;  %v1552_v3 = vsel %vm1470_vm3, %v1123_v21, 0.0  ;;  %v1775_v7 = vmul.f32 %v1123_v21, %v1123_v21  ;;  %2165 = vst.msk [vmem:[%s3318_s14 + $0x148] sm:$0xff] %vm1470_vm3, %v1123_v21  ;;  %v3713_v39 = vadd.f32 %v3314_v9, %v3526_v38 }
 0x17c   : > { %v1553_v11 = vadd.f32 %v1552_v3, %v1551_v63  ;;  %v1942_v14 = vadd.f32 %v1941_v17, %v1940_v2  ;;  %4631 = vst [vmem:[#allocation12_spill] sm:$0xff] %v3709_v25  ;;  %v1556_v43 = vsel %vm1470_vm3, %v1131_v56, 0.0  ;;  %v1945_v52 = vsel %vm1470_vm3, %v1776_v10, 0.0  ;;  %2207 = vst.msk [vmem:[%s3318_s14 + $0x298] sm:$0xff] %vm1470_vm3, %v3709_v25  ;;  %v3732_v56 = vpop.f32.mrb[37].mxu1 }
 0x17d   : > { %v1943_v18 = vsel %vm1470_vm3, %v1775_v7, 0.0  ;;  %v2672_v24 = vpop.f32.mrb[44].mxu0  ;;  %4632 = vst [vmem:[#allocation13_spill] sm:$0xff] %v3713_v39  ;;  %2205 = vst.msk [vmem:[%s3318_s14 + $0x288] sm:$0xff] %vm1470_vm3, %v3713_v39  ;;  %v3738_v17 = vpop.f32.mrb[38].mxu1  ;;  %v1947_v3 = vsel %vm1470_vm3, %v1777_v15, 0.0 }
 0x17e   : > { %v1555_v31 = vadd.f32 %v1554_v8, %v1553_v11  ;;  %v1144_v33 = vadd.f32 %v2672_v24, %v3314_v9  ;;  %v1135_v37 = vpop.f32.mrb[45].mxu0  ;;  %v1944_v45 = vadd.f32 %v1943_v18, %v1942_v14  ;;  %v3743_v8 = vpop.f32.mrb[39].mxu1 }
 0x17f   : > { %v1136_v30 = vadd.f32 %v3314_v9, %v1135_v37  ;;  %v2673_v59 = vpop.f32.mrb[46].mxu0 }
 0x180   : > { %v1557_v34 = vadd.f32 %v1556_v43, %v1555_v31  ;;  %2170 = vst.msk [vmem:[%s3318_s14 + $0x170] sm:$0xff] %vm1470_vm3, %v1144_v33  ;;  %v1147_v38 = vadd.f32 %v2673_v59, %v3314_v9  ;;  %v1138_v53 = vpop.f32.mrb[47].mxu0  ;;  %v1946_v21 = vadd.f32 %v1945_v52, %v1944_v45  ;;  %v1780_v24 = vmul.f32 %v1144_v33, %v1144_v33 }
 0x181   : > { %v1558_v62 = vsel %vm1470_vm3, %v1136_v30, 0.0  ;;  %v1778_v63 = vmul.f32 %v1136_v30, %v1136_v30  ;;  %2168 = vst.msk [vmem:[%s3318_s14 + $0x160] sm:$0xff] %vm1470_vm3, %v1136_v30  ;;  %v1139_v2 = vadd.f32 %v3314_v9, %v1138_v53  ;;  %v1562_v37 = vsel %vm1470_vm3, %v1144_v33, 0.0 }
 0x182   : > { %v1559_v7 = vadd.f32 %v1558_v62, %v1557_v34  ;;  %2171 = vst.msk [vmem:[%s3318_s14 + $0x178] sm:$0xff] %vm1470_vm3, %v1147_v38  ;;  %v1948_v10 = vadd.f32 %v1947_v3, %v1946_v21  ;;  %v1781_v30 = vmul.f32 %v1147_v38, %v1147_v38  ;;  %v1564_v53 = vsel %vm1470_vm3, %v1147_v38, 0.0 }
 0x183   : > { %v1949_v11 = vsel %vm1470_vm3, %v1778_v63, 0.0  ;;  %v1560_v14 = vsel %vm1470_vm3, %v1139_v2, 0.0  ;;  %v1779_v18 = vmul.f32 %v1139_v2, %v1139_v2  ;;  %2169 = vst.msk [vmem:[%s3318_s14 + $0x168] sm:$0xff] %vm1470_vm3, %v1139_v2  ;;  %v3756_v33 = vadd.f32 %v3552_v1, %v3314_v9  ;;  %v3758_v2 = vpop.f32.mrb[40].mxu1 }
 0x184   : > { %v1561_v31 = vadd.f32 %v1560_v14, %v1559_v7  ;;  %v1950_v43 = vadd.f32 %v1949_v11, %v1948_v10  ;;  %v1953_v3 = vsel %vm1470_vm3, %v1780_v24, 0.0  ;;  %v3764_v11 = vpop.f32.mrb[41].mxu1 }
 0x185   : > { %v1951_v15 = vsel %vm1470_vm3, %v1779_v18, 0.0  ;;  %v2676_v45 = vpop.f32.mrb[48].mxu0  ;;  %4633 = vst [vmem:[#allocation14_spill] sm:$0xff] %v3756_v33  ;;  %2210 = vst.msk [vmem:[%s3318_s14 + $0x2b0] sm:$0xff] %vm1470_vm3, %v3756_v33  ;;  %v3773_v24 = vpop.f32.mrb[42].mxu1 }
 0x186   : > { %v1563_v59 = vadd.f32 %v1562_v37, %v1561_v31  ;;  %v1160_v52 = vadd.f32 %v2676_v45, %v3314_v9  ;;  %v1151_v34 = vpop.f32.mrb[49].mxu0  ;;  %v1952_v21 = vadd.f32 %v1951_v15, %v1950_v43  ;;  %v1955_v37 = vsel %vm1470_vm3, %v1781_v30, 0.0  ;;  %v3778_v15 = vpop.f32.mrb[43].mxu1 }
 0x187   : > { %v1152_v62 = vadd.f32 %v3314_v9, %v1151_v34  ;;  %v2677_v63 = vpop.f32.mrb[50].mxu0 }
 0x188   : > { %v1565_v7 = vadd.f32 %v1564_v53, %v1563_v59  ;;  %2174 = vst.msk [vmem:[%s3318_s14 + $0x190] sm:$0xff] %vm1470_vm3, %v1160_v52  ;;  %v1163_v10 = vadd.f32 %v2677_v63, %v3314_v9  ;;  %v1154_v38 = vpop.f32.mrb[51].mxu0  ;;  %v1954_v14 = vadd.f32 %v1953_v3, %v1952_v21  ;;  %v1570_v21 = vsel %vm1470_vm3, %v1160_v52, 0.0 }
 0x189   : > { %v1566_v18 = vsel %vm1470_vm3, %v1152_v62, 0.0  ;;  %v1782_v31 = vmul.f32 %v1152_v62, %v1152_v62  ;;  %2172 = vst.msk [vmem:[%s3318_s14 + $0x180] sm:$0xff] %vm1470_vm3, %v1152_v62  ;;  %v1155_v1 = vadd.f32 %v3314_v9, %v1154_v38  ;;  %v1784_v62 = vmul.f32 %v1160_v52, %v1160_v52 }
 0x18a   : > { %v1567_v43 = vadd.f32 %v1566_v18, %v1565_v7  ;;  %2175 = vst.msk [vmem:[%s3318_s14 + $0x198] sm:$0xff] %vm1470_vm3, %v1163_v10  ;;  %v1956_v45 = vadd.f32 %v1955_v37, %v1954_v14  ;;  %v1785_v30 = vmul.f32 %v1163_v10, %v1163_v10  ;;  %v3788_v14 = vadd.f32 %v3314_v9, %v3564_v4 }
 0x18b   : > { %v1957_v59 = vsel %vm1470_vm3, %v1782_v31, 0.0  ;;  %v1568_v34 = vsel %vm1470_vm3, %v1155_v1, 0.0  ;;  %v1783_v53 = vmul.f32 %v1155_v1, %v1155_v1  ;;  %2173 = vst.msk [vmem:[%s3318_s14 + $0x188] sm:$0xff] %vm1470_vm3, %v1155_v1  ;;  %v3793_v52 = vadd.f32 %v3570_v13, %v3314_v9 }
 0x18c   : > { %v1569_v63 = vadd.f32 %v1568_v34, %v1567_v43  ;;  %v1958_v3 = vadd.f32 %v1957_v59, %v1956_v45  ;;  %4634 = vst [vmem:[#allocation15_spill] sm:$0xff] %v3788_v14  ;;  %v3797_v37 = vadd.f32 %v3314_v9, %v3575_v16  ;;  %v1572_v43 = vsel %vm1470_vm3, %v1163_v10, 0.0  ;;  %2208 = vst.msk [vmem:[%s3318_s14 + $0x2a0] sm:$0xff] %vm1470_vm3, %v3788_v14  ;;  %v3804_v34 = vpop.f32.mrb[44].mxu1 }
 0x18d   : > { %v1959_v7 = vsel %vm1470_vm3, %v1783_v53, 0.0  ;;  %v2680_v38 = vpop.f32.mrb[52].mxu0  ;;  %4635 = vst [vmem:[#allocation16_spill] sm:$0xff] %v3793_v52  ;;  %v1961_v53 = vsel %vm1470_vm3, %v1784_v62, 0.0  ;;  %2211 = vst.msk [vmem:[%s3318_s14 + $0x2b8] sm:$0xff] %vm1470_vm3, %v3793_v52  ;;  %v3816_v10 = vpop.f32.mrb[45].mxu1 }
 0x18e   : > { %v1571_v18 = vadd.f32 %v1570_v21, %v1569_v63  ;;  %v1176_v31 = vadd.f32 %v2680_v38, %v3314_v9  ;;  %v1167_v1 = vpop.f32.mrb[53].mxu0  ;;  %4636 = vst [vmem:[#allocation17_spill] sm:$0xff] %v3797_v37  ;;  %v1960_v45 = vadd.f32 %v1959_v7, %v1958_v3  ;;  %2209 = vst.msk [vmem:[%s3318_s14 + $0x2a8] sm:$0xff] %vm1470_vm3, %v3797_v37  ;;  %v3827_v38 = vpop.f32.mrb[46].mxu1 }
 0x18f   : > { %v1168_v4 = vadd.f32 %v3314_v9, %v1167_v1  ;;  %v2681_v59 = vpop.f32.mrb[54].mxu0 }
 0x190   : > { %v1573_v13 = vadd.f32 %v1572_v43, %v1571_v18  ;;  %2178 = vst.msk [vmem:[%s3318_s14 + $0x1b0] sm:$0xff] %vm1470_vm3, %v1176_v31  ;;  %v1179_v16 = vadd.f32 %v2681_v59, %v3314_v9  ;;  %v1170_v21 = vpop.f32.mrb[55].mxu0  ;;  %v1962_v63 = vadd.f32 %v1961_v53, %v1960_v45  ;;  %v3824_v9 = vld [vmem:[%s4599_s2] ss:$0 sm:$0xff]  ;;  %v1963_v18 = vsel %vm1470_vm3, %v1785_v30, 0.0  ;;  %v3832_v43 = vpop.f32.mrb[47].mxu1 }
 0x191   : > { %v1574_v3 = vsel %vm1470_vm3, %v1168_v4, 0.0  ;;  %v1786_v62 = vmul.f32 %v1168_v4, %v1168_v4  ;;  %2176 = vst.msk [vmem:[%s3318_s14 + $0x1a0] sm:$0xff] %vm1470_vm3, %v1168_v4  ;;  %v1171_v7 = vadd.f32 %v3824_v9, %v1170_v21  ;;  %v1788_v52 = vmul.f32 %v1176_v31, %v1176_v31 }
 0x192   : > { %v1575_v1 = vadd.f32 %v1574_v3, %v1573_v13  ;;  %2179 = vst.msk [vmem:[%s3318_s14 + $0x1b8] sm:$0xff] %vm1470_vm3, %v1179_v16  ;;  %v1964_v45 = vadd.f32 %v1963_v18, %v1962_v63  ;;  %v1578_v21 = vsel %vm1470_vm3, %v1176_v31, 0.0  ;;  %v1789_v3 = vmul.f32 %v1179_v16, %v1179_v16 }
 0x193   : > { %v1965_v59 = vsel %vm1470_vm3, %v1786_v62, 0.0  ;;  %v1576_v4 = vsel %vm1470_vm3, %v1171_v7, 0.0  ;;  %v1787_v53 = vmul.f32 %v1171_v7, %v1171_v7  ;;  %2177 = vst.msk [vmem:[%s3318_s14 + $0x1a8] sm:$0xff] %vm1470_vm3, %v1171_v7  ;;  %v1580_v62 = vsel %vm1470_vm3, %v1179_v16, 0.0 }
 0x194   : > { %v1577_v33 = vadd.f32 %v1576_v4, %v1575_v1  ;;  %v1966_v37 = vadd.f32 %v1965_v59, %v1964_v45  ;;  %v3845_v31 = vadd.f32 %v3824_v9, %v3590_v50  ;;  %v3847_v45 = vpop.f32.mrb[48].mxu1 }
 0x195   : > { %v1967_v30 = vsel %vm1470_vm3, %v1787_v53, 0.0  ;;  %v2684_v13 = vpop.f32.mrb[56].mxu0 }
 0x196   : > { %v1579_v14 = vadd.f32 %v1578_v21, %v1577_v33  ;;  %v1192_v63 = vadd.f32 %v3824_v9, %v2684_v13  ;;  %v1183_v18 = vpop.f32.mrb[57].mxu0  ;;  %v1968_v25 = vadd.f32 %v1967_v30, %v1966_v37  ;;  %4637 = vst [vmem:[#allocation18_spill] sm:$0xff] %v3845_v31  ;;  %v1969_v33 = vsel %vm1470_vm3, %v1788_v52, 0.0  ;;  %v3853_v37 = vpop.f32.mrb[49].mxu1  ;;  %2214 = vst.msk [vmem:[%s3318_s14 + $0x2d0] sm:$0xff] %vm1470_vm3, %v3845_v31 }
 0x197   : > { %v1184_v7 = vadd.f32 %v3824_v9, %v1183_v18  ;;  %v2685_v1 = vpop.f32.mrb[58].mxu0  ;;  %v1971_v52 = vsel %vm1470_vm3, %v1789_v3, 0.0 }
 0x198   : > { %v1581_v59 = vadd.f32 %v1580_v62, %v1579_v14  ;;  %2182 = vst.msk [vmem:[%s3318_s14 + $0x1d0] sm:$0xff] %vm1470_vm3, %v1192_v63  ;;  %v1195_v4 = vadd.f32 %v3824_v9, %v2685_v1  ;;  %v1186_v16 = vpop.f32.mrb[59].mxu0  ;;  %v1970_v53 = vadd.f32 %v1969_v33, %v1968_v25  ;;  %v3862_v14 = vpop.f32.mrb[50].mxu1  ;;  %v1586_v33 = vsel %vm1470_vm3, %v1192_v63, 0.0 }
 0x199   : > { %v1582_v21 = vsel %vm1470_vm3, %v1184_v7, 0.0  ;;  %v1790_v30 = vmul.f32 %v1184_v7, %v1184_v7  ;;  %2180 = vst.msk [vmem:[%s3318_s14 + $0x1c0] sm:$0xff] %vm1470_vm3, %v1184_v7  ;;  %v1187_v50 = vadd.f32 %v3824_v9, %v1186_v16  ;;  %v3867_v18 = vpop.f32.mrb[51].mxu1  ;;  %v1792_v16 = vmul.f32 %v1192_v63, %v1192_v63 }
 0x19a   : > { %v1583_v13 = vadd.f32 %v1582_v21, %v1581_v59  ;;  %2183 = vst.msk [vmem:[%s3318_s14 + $0x1d8] sm:$0xff] %vm1470_vm3, %v1195_v4  ;;  %v1972_v25 = vadd.f32 %v1971_v52, %v1970_v53  ;;  %v1793_v3 = vmul.f32 %v1195_v4, %v1195_v4  ;;  %v3877_v53 = vadd.f32 %v3824_v9, %v3596_v58 }
 0x19b   : > { %v1973_v62 = vsel %vm1470_vm3, %v1790_v30, 0.0  ;;  %v1584_v1 = vsel %vm1470_vm3, %v1187_v50, 0.0  ;;  %v1791_v7 = vmul.f32 %v1187_v50, %v1187_v50  ;;  %2181 = vst.msk [vmem:[%s3318_s14 + $0x1c8] sm:$0xff] %vm1470_vm3, %v1187_v50  ;;  %v3882_v63 = vadd.f32 %v3824_v9, %v3605_v0 }
 0x19c   : > { %v1585_v31 = vadd.f32 %v1584_v1, %v1583_v13  ;;  %v1974_v32 = vadd.f32 %v1973_v62, %v1972_v25  ;;  %4638 = vst [vmem:[#allocation19_spill] sm:$0xff] %v3877_v53  ;;  %v3886_v13 = vadd.f32 %v3824_v9, %v3610_v20  ;;  %v1588_v25 = vsel %vm1470_vm3, %v1195_v4, 0.0  ;;  %2212 = vst.msk [vmem:[%s3318_s14 + $0x2c0] sm:$0xff] %vm1470_vm3, %v3877_v53  ;;  %v3893_v1 = vpop.f32.mrb[52].mxu1 }
 0x19d   : > { %v1975_v59 = vsel %vm1470_vm3, %v1791_v7, 0.0  ;;  %v2688_v21 = vpop.f32.mrb[60].mxu0  ;;  %4639 = vst [vmem:[#allocation20_spill] sm:$0xff] %v3882_v63  ;;  %v1977_v7 = vsel %vm1470_vm3, %v1792_v16, 0.0  ;;  %2215 = vst.msk [vmem:[%s3318_s14 + $0x2d8] sm:$0xff] %vm1470_vm3, %v3882_v63 }
 0x19e   : > { %v1587_v30 = vadd.f32 %v1586_v33, %v1585_v31  ;;  %v1208_v52 = vadd.f32 %v3824_v9, %v2688_v21  ;;  %v1199_v50 = vpop.f32.mrb[61].mxu0  ;;  %4640 = vst [vmem:[#allocation21_spill] sm:$0xff] %v3886_v13  ;;  %v1976_v62 = vadd.f32 %v1975_v59, %v1974_v32  ;;  %2213 = vst.msk [vmem:[%s3318_s14 + $0x2c8] sm:$0xff] %vm1470_vm3, %v3886_v13  ;;  %v3905_v32 = vpop.f32.mrb[53].mxu1 }
 0x19f   : > { %v1200_v58 = vadd.f32 %v3824_v9, %v1199_v50  ;;  %v2689_v31 = vpop.f32.mrb[62].mxu0  ;;  %v1979_v50 = vsel %vm1470_vm3, %v1793_v3, 0.0 }
 0x1a0   : > { %v1589_v0 = vadd.f32 %v1588_v25, %v1587_v30  ;;  %2186 = vst.msk [vmem:[%s3318_s14 + $0x1f0] sm:$0xff] %vm1470_vm3, %v1208_v52  ;;  %v1211_v20 = vadd.f32 %v3824_v9, %v2689_v31  ;;  %v1202_v33 = vpop.f32.mrb[63].mxu0  ;;  %v1978_v4 = vadd.f32 %v1977_v7, %v1976_v62  ;;  %v3911_v30 = vpop.f32.mrb[54].mxu1 }
 0x1a1   : > { %v1590_v59 = vsel %vm1470_vm3, %v1200_v58, 0.0  ;;  %v1794_v16 = vmul.f32 %v1200_v58, %v1200_v58  ;;  %2184 = vst.msk [vmem:[%s3318_s14 + $0x1e0] sm:$0xff] %vm1470_vm3, %v1200_v58  ;;  %v1203_v21 = vadd.f32 %v3824_v9, %v1202_v33  ;;  %v3916_v31 = vpop.f32.mrb[55].mxu1  ;;  %v1796_v58 = vmul.f32 %v1208_v52, %v1208_v52 }
 0x1a2   : > { %v1591_v25 = vadd.f32 %v1590_v59, %v1589_v0  ;;  %2187 = vst.msk [vmem:[%s3318_s14 + $0x1f8] sm:$0xff] %vm1470_vm3, %v1211_v20  ;;  %v1980_v63 = vadd.f32 %v1979_v50, %v1978_v4  ;;  %v1594_v33 = vsel %vm1470_vm3, %v1208_v52, 0.0  ;;  %v1798_v0 = vmul.f32 %v3378_v23, %v3378_v23 }
 0x1a3   : > { %v1981_v13 = vsel %vm1470_vm3, %v1794_v16, 0.0  ;;  %v1592_v62 = vsel %vm1470_vm3, %v1203_v21, 0.0  ;;  %v1795_v7 = vmul.f32 %v1203_v21, %v1203_v21  ;;  %2185 = vst.msk [vmem:[%s3318_s14 + $0x1e8] sm:$0xff] %vm1470_vm3, %v1203_v21  ;;  %v1797_v4 = vmul.f32 %v1211_v20, %v1211_v20 }
 0x1a4   : > { %v1593_v53 = vadd.f32 %v1592_v62, %v1591_v25  ;;  %v1982_v39 = vadd.f32 %v1981_v13, %v1980_v63  ;;  %v1598_v16 = vsel %vm1470_vm3, %v3378_v23, 0.0  ;;  %v3930_v21 = vadd.f32 %v3824_v9, %v3636_v44  ;;  %v3941_v25 = vpop.f32.mrb[56].mxu1 }
 0x1a5   : > { %v1983_v3 = vsel %vm1470_vm3, %v1795_v7, 0.0  ;;  %v1596_v50 = vsel %vm1470_vm3, %v1211_v20, 0.0  ;;  %v3935_v63 = vadd.f32 %v3824_v9, %v3648_v48  ;;  %v3939_v13 = vadd.f32 %v3824_v9, %v3654_v57  ;;  %v3947_v44 = vpop.f32.mrb[57].mxu1 }
 0x1a6   : > { %v1595_v59 = vadd.f32 %v1594_v33, %v1593_v53  ;;  %v1984_v52 = vadd.f32 %v1983_v3, %v1982_v39  ;;  %v1985_v53 = vsel %vm1470_vm3, %v1796_v58, 0.0  ;;  %2218 = vst.msk [vmem:[%s3318_s14 + $0x2f0] sm:$0xff] %vm1470_vm3, %v3930_v21  ;;  %v1989_v39 = vsel %vm1470_vm3, %v1798_v0, 0.0  ;;  %v3956_v48 = vpop.f32.mrb[58].mxu1 }
 0x1a7   : > { %2216 = vst.msk [vmem:[%s3318_s14 + $0x2e0] sm:$0xff] %vm1470_vm3, %v3935_v63  ;;  %2219 = vst.msk [vmem:[%s3318_s14 + $0x2f8] sm:$0xff] %vm1470_vm3, %v3939_v13  ;;  %v1987_v57 = vsel %vm1470_vm3, %v1797_v4, 0.0  ;;  %v1799_v7 = vmul.f32 %v3385_v28, %v3385_v28  ;;  %v3963_v58 = vadd.f32 %v3824_v9, %v3659_v12  ;;  %v3965_v33 = vpop.f32.mrb[59].mxu1  ;;  %v1600_v0 = vsel %vm1470_vm3, %v3385_v28, 0.0 }
 0x1a8   : > { %v1597_v23 = vadd.f32 %v1596_v50, %v1595_v59  ;;  %v1986_v20 = vadd.f32 %v1985_v53, %v1984_v52  ;;  %v3971_v59 = vadd.f32 %v3824_v9, %v3674_v51  ;;  %v3975_v4 = vadd.f32 %v3824_v9, %v3680_v42 }
 0x1a9   : > { %2217 = vst.msk [vmem:[%s3318_s14 + $0x2e8] sm:$0xff] %vm1470_vm3, %v3963_v58  ;;  %v1602_v12 = vsel %vm1470_vm3, %v3375_v22, 0.0  ;;  %v1604_v28 = vsel %vm1470_vm3, %v3382_v27, 0.0  ;;  %v1801_v51 = vmul.f32 %v3382_v27, %v3382_v27  ;;  %v1991_v53 = vsel %vm1470_vm3, %v1799_v7, 0.0 }
 0x1aa   : > { %v1599_v62 = vadd.f32 %v1598_v16, %v1597_v23  ;;  %v1988_v3 = vadd.f32 %v1987_v57, %v1986_v20  ;;  %v1800_v16 = vmul.f32 %v3375_v22, %v3375_v22  ;;  %2222 = vst.msk [vmem:[%s3318_s14 + $0x310] sm:$0xff] %vm1470_vm3, %v3971_v59  ;;  %2220 = vst.msk [vmem:[%s3318_s14 + $0x300] sm:$0xff] %vm1470_vm3, %v3975_v4  ;;  %v1606_v27 = vsel %vm1470_vm3, %v3454_v36, 0.0 }
 0x1ab   : > { %v1802_v22 = vmul.f32 %v3454_v36, %v3454_v36  ;;  %v3999_v23 = vadd.f32 %v3824_v9, %v3689_v55  ;;  %v4009_v57 = vadd.f32 %v3824_v9, %v3720_v47  ;;  %v1995_v36 = vsel %vm1470_vm3, %v1801_v51, 0.0 }
 0x1ac   : > { %v1601_v50 = vadd.f32 %v1600_v0, %v1599_v62  ;;  %v1990_v52 = vadd.f32 %v1989_v39, %v1988_v3  ;;  %v4005_v39 = vadd.f32 %v3824_v9, %v3694_v46  ;;  %v4011_v62 = vpop.f32.mrb[60].mxu1  ;;  %v1993_v7 = vsel %vm1470_vm3, %v1800_v16, 0.0 }
 0x1ad   : > { %2223 = vst.msk [vmem:[%s3318_s14 + $0x318] sm:$0xff] %vm1470_vm3, %v3999_v23  ;;  %v4017_v55 = vpop.f32.mrb[61].mxu1  ;;  %2226 = vst.msk [vmem:[%s3318_s14 + $0x330] sm:$0xff] %vm1470_vm3, %v4009_v57  ;;  %v1997_v16 = vsel %vm1470_vm3, %v1802_v22, 0.0  ;;  %v1608_v51 = vsel %vm1470_vm3, %v3461_v41, 0.0  ;;  %v1804_v22 = vmul.f32 %v3423_v5, %v3423_v5 }
 0x1ae   : > { %v1603_v42 = vadd.f32 %v1602_v12, %v1601_v50  ;;  %v1992_v20 = vadd.f32 %v1991_v53, %v1990_v52  ;;  %2221 = vst.msk [vmem:[%s3318_s14 + $0x308] sm:$0xff] %vm1470_vm3, %v4005_v39  ;;  %v4026_v46 = vpop.f32.mrb[62].mxu1  ;;  %v1803_v50 = vmul.f32 %v3461_v41, %v3461_v41  ;;  %v4033_v12 = vadd.f32 %v3824_v9, %v3732_v56 }
 0x1af   : > { %v4035_v52 = vpop.f32.mrb[63].mxu1  ;;  %v4045_v53 = vadd.f32 %v3824_v9, %v3743_v8  ;;  %v1610_v56 = vsel %vm1470_vm3, %v3423_v5, 0.0  ;;  %v1806_v5 = vmul.f32 %v3536_v54, %v3536_v54 }
 0x1b0   : > { %v1605_v3 = vadd.f32 %v1604_v28, %v1603_v42  ;;  %v1994_v0 = vadd.f32 %v1993_v7, %v1992_v20  ;;  %v4041_v42 = vadd.f32 %v3824_v9, %v3738_v17  ;;  %2224 = vst.msk [vmem:[%s3318_s14 + $0x320] sm:$0xff] %vm1470_vm3, %v4033_v12  ;;  %v1612_v17 = vsel %vm1470_vm3, %v3458_v40, 0.0 }
 0x1b1   : > { %2225 = vst.msk [vmem:[%s3318_s14 + $0x328] sm:$0xff] %vm1470_vm3, %v4045_v53  ;;  %v1999_v7 = vsel %vm1470_vm3, %v1803_v50, 0.0 }
 0x1b2   : > { %v1607_v47 = vadd.f32 %v1606_v27, %v1605_v3  ;;  %v1996_v28 = vadd.f32 %v1995_v36, %v1994_v0  ;;  %v1805_v27 = vmul.f32 %v3458_v40, %v3458_v40  ;;  %2227 = vst.msk [vmem:[%s3318_s14 + $0x338] sm:$0xff] %vm1470_vm3, %v4041_v42  ;;  %v4069_v3 = vadd.f32 %v3824_v9, %v3758_v2 }
 0x1b3   : > { %v1614_v40 = vsel %vm1470_vm3, %v3536_v54, 0.0  ;;  %v4075_v0 = vadd.f32 %v3824_v9, %v3764_v11  ;;  %v2005_v11 = vsel %vm1470_vm3, %v1806_v5, 0.0  ;;  %v4131_v5 = vadd.f32 %v3824_v9, %v3827_v38 }
 0x1b4   : > { %v1609_v20 = vadd.f32 %v1608_v51, %v1607_v47  ;;  %v1998_v41 = vadd.f32 %v1997_v16, %v1996_v28  ;;  %v4079_v47 = vadd.f32 %v3824_v9, %v3773_v24  ;;  %v2001_v16 = vsel %vm1470_vm3, %v1804_v22, 0.0  ;;  %2230 = vst.msk [vmem:[%s3318_s14 + $0x350] sm:$0xff] %vm1470_vm3, %v4069_v3 }
 0x1b5   : > { %v2003_v2 = vsel %vm1470_vm3, %v1805_v27, 0.0  ;;  %2228 = vst.msk [vmem:[%s3318_s14 + $0x340] sm:$0xff] %vm1470_vm3, %v4075_v0  ;;  %v1807_v24 = vmul.f32 %v3545_v61, %v3545_v61  ;;  %v4097_v51 = vadd.f32 %v3824_v9, %v3778_v15  ;;  %v1618_v15 = vsel %vm1470_vm3, %v3504_v19, 0.0  ;;  %2235 = vst.msk [vmem:[%s3318_s14 + $0x378] sm:$0xff] %vm1470_vm3, %v4131_v5 }
 0x1b6   : > { %v1611_v8 = vadd.f32 %v1610_v56, %v1609_v20  ;;  %v2000_v36 = vadd.f32 %v1999_v7, %v1998_v41  ;;  %2231 = vst.msk [vmem:[%s3318_s14 + $0x358] sm:$0xff] %vm1470_vm3, %v4079_v47  ;;  %v1616_v20 = vsel %vm1470_vm3, %v3545_v61, 0.0  ;;  %v4103_v56 = vadd.f32 %v3824_v9, %v3804_v34 }
 0x1b7   : > { %v4107_v41 = vadd.f32 %v3824_v9, %v3816_v10  ;;  %2229 = vst.msk [vmem:[%s3318_s14 + $0x348] sm:$0xff] %vm1470_vm3, %v4097_v51  ;;  %v1620_v34 = vsel %vm1470_vm3, %v3541_v60, 0.0  ;;  %v2007_v7 = vsel %vm1470_vm3, %v1807_v24, 0.0  ;;  %v1624_v24 = vsel %vm1470_vm3, %v3629_v35, 0.0 }
 0x1b8   : > { %v1613_v50 = vadd.f32 %v1612_v17, %v1611_v8  ;;  %v2002_v28 = vadd.f32 %v2001_v16, %v2000_v36  ;;  %v1808_v17 = vmul.f32 %v3504_v19, %v3504_v19  ;;  %v1809_v8 = vmul.f32 %v3541_v60, %v3541_v60  ;;  %2234 = vst.msk [vmem:[%s3318_s14 + $0x370] sm:$0xff] %vm1470_vm3, %v4103_v56 }
 0x1b9   : > { %2232 = vst.msk [vmem:[%s3318_s14 + $0x360] sm:$0xff] %vm1470_vm3, %v4107_v41  ;;  %v1810_v19 = vmul.f32 %v3620_v29, %v3620_v29  ;;  %v1622_v60 = vsel %vm1470_vm3, %v3620_v29, 0.0  ;;  %v4141_v16 = vadd.f32 %v3824_v9, %v3847_v45  ;;  %v1811_v45 = vmul.f32 %v3629_v35, %v3629_v35 }
 0x1ba   : > { %v1615_v54 = vadd.f32 %v1614_v40, %v1613_v50  ;;  %v2004_v22 = vadd.f32 %v2003_v2, %v2002_v28  ;;  %v4137_v40 = vadd.f32 %v3824_v9, %v3832_v43  ;;  %v2009_v50 = vsel %vm1470_vm3, %v1808_v17, 0.0 }
 0x1bb   : > { %v2011_v38 = vsel %vm1470_vm3, %v1809_v8, 0.0  ;;  %2238 = vst.msk [vmem:[%s3318_s14 + $0x390] sm:$0xff] %vm1470_vm3, %v4141_v16  ;;  %v2013_v43 = vsel %vm1470_vm3, %v1810_v19, 0.0  ;;  %v1812_v17 = vmul.f32 %v3588_v49, %v3588_v49 }
 0x1bc   : > { %v1617_v27 = vadd.f32 %v1616_v20, %v1615_v54  ;;  %v2006_v61 = vadd.f32 %v2005_v11, %v2004_v22  ;;  %2233 = vst.msk [vmem:[%s3318_s14 + $0x368] sm:$0xff] %vm1470_vm3, %v4137_v40  ;;  %v4159_v54 = vadd.f32 %v3824_v9, %v3853_v37  ;;  %v4165_v22 = vadd.f32 %v3824_v9, %v3862_v14 }
 0x1bd   : > { %v4169_v20 = vadd.f32 %v3824_v9, %v3867_v18  ;;  %v1626_v37 = vsel %vm1470_vm3, %v3588_v49, 0.0  ;;  %v1628_v14 = vsel %vm1470_vm3, %v3625_v6, 0.0  ;;  %v1814_v49 = vmul.f32 %v3704_v26, %v3704_v26 }
 0x1be   : > { %v1619_v10 = vadd.f32 %v1618_v15, %v1617_v27  ;;  %v2008_v36 = vadd.f32 %v2007_v7, %v2006_v61  ;;  %2236 = vst.msk [vmem:[%s3318_s14 + $0x380] sm:$0xff] %vm1470_vm3, %v4159_v54  ;;  %v1813_v15 = vmul.f32 %v3625_v6, %v3625_v6  ;;  %2239 = vst.msk [vmem:[%s3318_s14 + $0x398] sm:$0xff] %vm1470_vm3, %v4165_v22  ;;  %v2015_v61 = vsel %vm1470_vm3, %v1811_v45, 0.0  ;;  %v4642_v45 = vld [vmem:[#allocation11_spill] sm:$0xff] }
 0x1bf   : > { %2237 = vst.msk [vmem:[%s3318_s14 + $0x388] sm:$0xff] %vm1470_vm3, %v4169_v20  ;;  %v1630_v6 = vsel %vm1470_vm3, %v3704_v26, 0.0  ;;  %v4203_v7 = vadd.f32 %v3824_v9, %v3911_v30  ;;  %v2017_v19 = vsel %vm1470_vm3, %v1812_v17, 0.0  ;;  %v4641_v30 = vld [vmem:[#allocation13_spill] sm:$0xff] }
 0x1c0   : > { %v1621_v2 = vadd.f32 %v1620_v34, %v1619_v10  ;;  %v2010_v28 = vadd.f32 %v2009_v50, %v2008_v36  ;;  %v4193_v34 = vadd.f32 %v3824_v9, %v3893_v1  ;;  %v4199_v10 = vadd.f32 %v3824_v9, %v3905_v32 }
 0x1c1   : > { %v2019_v1 = vsel %vm1470_vm3, %v1813_v15, 0.0  ;;  %2243 = vst.msk [vmem:[%s3318_s14 + $0x3b8] sm:$0xff] %vm1470_vm3, %v4203_v7  ;;  %v2021_v32 = vsel %vm1470_vm3, %v1814_v49, 0.0  ;;  %v1815_v50 = vmul.f32 %v4641_v30, %v4641_v30 }
 0x1c2   : > { %v1623_v29 = vadd.f32 %v1622_v60, %v1621_v2  ;;  %v2012_v11 = vadd.f32 %v2011_v38, %v2010_v28  ;;  %2242 = vst.msk [vmem:[%s3318_s14 + $0x3b0] sm:$0xff] %vm1470_vm3, %v4193_v34  ;;  %2240 = vst.msk [vmem:[%s3318_s14 + $0x3a0] sm:$0xff] %vm1470_vm3, %v4199_v10  ;;  %v4221_v2 = vadd.f32 %v3824_v9, %v3916_v31  ;;  %v1632_v28 = vsel %vm1470_vm3, %v4641_v30, 0.0 }
 0x1c3   : > { %v1634_v31 = vsel %vm1470_vm3, %v4642_v45, 0.0 }
 0x1c4   : > { %v1625_v27 = vadd.f32 %v1624_v24, %v1623_v29  ;;  %v2014_v35 = vadd.f32 %v2013_v43, %v2012_v11  ;;  %v4227_v29 = vadd.f32 %v3824_v9, %v3941_v25  ;;  %v4231_v43 = vadd.f32 %v3824_v9, %v3947_v44  ;;  %2241 = vst.msk [vmem:[%s3318_s14 + $0x3a8] sm:$0xff] %vm1470_vm3, %v4221_v2 }
 0x1c5   : > { %v1816_v11 = vmul.f32 %v4642_v45, %v4642_v45 }
 0x1c6   : > { %v1627_v18 = vadd.f32 %v1626_v37, %v1625_v27  ;;  %v2016_v8 = vadd.f32 %v2015_v61, %v2014_v35  ;;  %v4643_v27 = vld [vmem:[#allocation12_spill] sm:$0xff]  ;;  %2246 = vst.msk [vmem:[%s3318_s14 + $0x3d0] sm:$0xff] %vm1470_vm3, %v4227_v29  ;;  %2244 = vst.msk [vmem:[%s3318_s14 + $0x3c0] sm:$0xff] %vm1470_vm3, %v4231_v43  ;;  %v2023_v35 = vsel %vm1470_vm3, %v1815_v50, 0.0 }
 0x1c7   : > { %v1636_v25 = vsel %vm1470_vm3, %v4643_v27, 0.0  ;;  %v1817_v44 = vmul.f32 %v4643_v27, %v4643_v27  ;;  %v4648_v27 = vld [vmem:[#allocation19_spill] sm:$0xff] }
 0x1c8   : > { %v1629_v36 = vadd.f32 %v1628_v14, %v1627_v18  ;;  %v2018_v60 = vadd.f32 %v2017_v19, %v2016_v8  ;;  %v4644_v14 = vld [vmem:[#allocation15_spill] sm:$0xff]  ;;  %v4255_v18 = vadd.f32 %v3824_v9, %v3956_v48  ;;  %v4261_v8 = vadd.f32 %v3824_v9, %v3965_v33 }
 0x1c9   : > { %v1818_v15 = vmul.f32 %v4644_v14, %v4644_v14  ;;  %v1638_v49 = vsel %vm1470_vm3, %v4644_v14, 0.0  ;;  %v2025_v19 = vsel %vm1470_vm3, %v1816_v11, 0.0  ;;  %v2027_v48 = vsel %vm1470_vm3, %v1817_v44, 0.0 }
 0x1ca   : > { %v1631_v26 = vadd.f32 %v1630_v6, %v1629_v36  ;;  %v2020_v38 = vadd.f32 %v2019_v1, %v2018_v60  ;;  %v4265_v6 = vadd.f32 %v3824_v9, %v4011_v62  ;;  %2247 = vst.msk [vmem:[%s3318_s14 + $0x3d8] sm:$0xff] %vm1470_vm3, %v4255_v18  ;;  %2245 = vst.msk [vmem:[%s3318_s14 + $0x3c8] sm:$0xff] %vm1470_vm3, %v4261_v8  ;;  %v4645_v60 = vld [vmem:[#allocation17_spill] sm:$0xff] }
 0x1cb   : > { %v2029_v62 = vsel %vm1470_vm3, %v1818_v15, 0.0  ;;  %v1640_v50 = vsel %vm1470_vm3, %v4645_v60, 0.0 }
 0x1cc   : > { %v1633_v24 = vadd.f32 %v1632_v28, %v1631_v26  ;;  %v2022_v17 = vadd.f32 %v2021_v32, %v2020_v38  ;;  %2250 = vst.msk [vmem:[%s3318_s14 + $0x3f0] sm:$0xff] %vm1470_vm3, %v4265_v6  ;;  %v1819_v26 = vmul.f32 %v4645_v60, %v4645_v60  ;;  %v4285_v32 = vadd.f32 %v3824_v9, %v4017_v55  ;;  %v4646_v28 = vld [vmem:[#allocation14_spill] sm:$0xff] }
 0x1cd   : > { %v4298_v38 = vadd.f32 %v3824_v9, %v4026_v46  ;;  %v4302_v55 = vadd.f32 %v3824_v9, %v4035_v52  ;;  %v1820_v45 = vmul.f32 %v4646_v28, %v4646_v28  ;;  %v4647_v9 = vld [vmem:[#allocation16_spill] sm:$0xff] }
 0x1ce   : > { %v1635_v37 = vadd.f32 %v1634_v31, %v1633_v24  ;;  %v2024_v61 = vadd.f32 %v2023_v35, %v2022_v17  ;;  %2248 = vst.msk [vmem:[%s3318_s14 + $0x3e0] sm:$0xff] %vm1470_vm3, %v4285_v32  ;;  %v1642_v24 = vsel %vm1470_vm3, %v4646_v28, 0.0  ;;  %v1821_v46 = vmul.f32 %v4647_v9, %v4647_v9 }
 0x1cf   : > { %2251 = vst.msk [vmem:[%s3318_s14 + $0x3f8] sm:$0xff] %vm1470_vm3, %v4298_v38  ;;  %2249 = vst.msk [vmem:[%s3318_s14 + $0x3e8] sm:$0xff] %vm1470_vm3, %v4302_v55  ;;  %v2031_v17 = vsel %vm1470_vm3, %v1819_v26, 0.0 }
 0x1d0   : > { %v1637_v36 = vadd.f32 %v1636_v25, %v1635_v37  ;;  %v2026_v1 = vadd.f32 %v2025_v19, %v2024_v61  ;;  %v1822_v25 = vmul.f32 %v4648_v27, %v4648_v27 }
 0x1d2   : > { %v1639_v33 = vadd.f32 %v1638_v49, %v1637_v36  ;;  %v2028_v30 = vadd.f32 %v2027_v48, %v2026_v1 }
 0x1d4   : > { %v1641_v11 = vadd.f32 %v1640_v50, %v1639_v33  ;;  %v2030_v31 = vadd.f32 %v2029_v62, %v2028_v30 }
 0x1d6   : > { %v1643_v52 = vadd.f32 %v1642_v24, %v1641_v11 }
 0x1d7   : > { %2933 = shalt.err (!%p2930_p2)
}
 0x1d8   : > { %s2934_s6 = scalar_lea.hbm %s4290_s23, 16384  ;;  %s2938_s14 = scalar_lea.hbm %s4600_s3, 32768 }
 0x1d9   : > { %p2935_p4 = scmp.ne.s32.totalorder %s4290_s23, %s2934_s6  ;;  %p2939_p9 = scmp.lt.u32.totalorder %s4290_s23, %s4600_s3 }
 0x1da   : > { %p2940_p1 = scmp.lt.u32.totalorder %s2938_s14, %s2934_s6  ;;  %p2942_p6 = scmp.lt.u32.totalorder %s2934_s6, %s4290_s23 }
 0x1db   : > { %p2936_p5 = pnand %p2935_p4, %p4649_p11 }
 0x1dc   : > { %p2941_p3 = por %p2940_p1, %p2939_p9 }
 0x1dd   : > { %p2937_p7 = pneg %p2936_p5 }
 0x1de   : > { %p2943_p12 = por %p2942_p6, %p2941_p3 }
 0x1e0   : > { %p2944_p13 = pnand %p2943_p12, %p2937_p7 }
 0x1e2   : > { %2947 = shalt.err (!%p2944_p13)
}
 0x1e3   : > { %s3025_s8 = smov 128   ;;  %s3026_s11 = smov 8   ;;  %v1644_v44 = vsel %vm1470_vm3, %v4647_v9, 0.0  ;;  %v2032_v37 = vadd.f32 %v2031_v17, %v2030_v31  ;;  %v1646_v35 = vsel %vm1470_vm3, %v4648_v27, 0.0  ;;  %v2033_v14 = vsel %vm1470_vm3, %v1820_v45, 0.0  ;;  %v4650_v48 = vld [vmem:[#allocation21_spill] sm:$0xff] }
 0x1e4   : > { %2766 = dma.vmem_to_hbm [thread:$0]  (%p4649_p11), %s4292_s10, 16384, %s4290_s23, %s2253_s25, %s3025_s8, %s3025_s8, %s3026_s11   ;;  %v1645_v15 = vadd.f32 %v1644_v44, %v1643_v52  ;;  %v2035_v49 = vsel %vm1470_vm3, %v1821_v46, 0.0  ;;  %v2037_v36 = vsel %vm1470_vm3, %v1822_v25, 0.0  ;;  %v1823_v1 = vmul.f32 %v4650_v48, %v4650_v48  ;;  %v4651_v60 = vld [vmem:[#allocation18_spill] sm:$0xff]  ;;  %v4652_v45 = vld [vmem:[#allocation20_spill] sm:$0xff] }
 0x1e5   : > { %v2034_v61 = vadd.f32 %v2033_v14, %v2032_v37  ;;  %v1648_v62 = vsel %vm1470_vm3, %v4650_v48, 0.0  ;;  %v1824_v26 = vmul.f32 %v4651_v60, %v4651_v60  ;;  %v1650_v50 = vsel %vm1470_vm3, %v4651_v60, 0.0  ;;  %s2400_s10 = sshll.u32 %s3157_s13, 1  ;;  %s2540_s12 = sshll.u32 %s3074_s19, 5 }
 0x1e6   : > { %v1647_v19 = vadd.f32 %v1646_v35, %v1645_v15  ;;  %v1825_v11 = vmul.f32 %v4652_v45, %v4652_v45  ;;  %v2039_v31 = vsel %vm1470_vm3, %v1823_v1, 0.0  ;;  %v1826_v9 = vmul.f32 %v3935_v63, %v3935_v63  ;;  %s227_s23 = scalar_lea.vmem [#allocation6], %s2400_s10  ;;  %s4553_s30 = scalar_lea.hbm %s4601_s4, %s2540_s12 }
 0x1e7   : > { %v2036_v33 = vadd.f32 %v2035_v49, %v2034_v61  ;;  %v1652_v46 = vsel %vm1470_vm3, %v4652_v45, 0.0  ;;  %v1654_v17 = vsel %vm1470_vm3, %v3935_v63, 0.0  ;;  %v2041_v27 = vsel %vm1470_vm3, %v1824_v26, 0.0  ;;  %s2288_s25 = sshll.u32 %s227_s23, 4  ;;  %s2258_s5 = scalar_lea.sflag [#allocation7], %s3157_s13  ;;  %s4555_s25 = int_to_ptr.vmem [resolvable:$true] %s2288_s25 }
 0x1e8   : > { %v1649_v30 = vadd.f32 %v1648_v62, %v1647_v19  ;;  %v2043_v37 = vsel %vm1470_vm3, %v1825_v11, 0.0  ;;  %v2045_v14 = vsel %vm1470_vm3, %v1826_v9, 0.0  ;;  %v1827_v15 = vmul.f32 %v3963_v58, %v3963_v58  ;;  %s2948_s6 = scalar_lea.vmem %s4555_s25, 32  ;;  %s3027_s19 = smov [#allocation6]  }
 0x1e9   : > { %v2038_v28 = vadd.f32 %v2037_v36, %v2036_v33  ;;  %v1656_v49 = vsel %vm1470_vm3, %v3963_v58, 0.0  ;;  %v1828_v19 = vmul.f32 %v3930_v21, %v3930_v21  ;;  %v1658_v36 = vsel %vm1470_vm3, %v3930_v21, 0.0  ;;  %p2949_p8 = scmp.ne.s32.totalorder %s4555_s25, %s2948_s6  ;;  %s2952_s7 = sshll.u32 %s3027_s19, 4  ;;  %s2953_s7 = int_to_ptr.vmem [resolvable:$false] %s2952_s7 }
 0x1ea   : > { %v1651_v24 = vadd.f32 %v1650_v50, %v1649_v30  ;;  %v1829_v1 = vmul.f32 %v3939_v13, %v3939_v13  ;;  %v2047_v62 = vsel %vm1470_vm3, %v1827_v15, 0.0  ;;  %v1830_v60 = vmul.f32 %v3975_v4, %v3975_v4  ;;  %s2954_s9 = scalar_lea.vmem %s2953_s7, 64  ;;  %p2955_p2 = scmp.lt.s32.totalorder %s4555_s25, %s2953_s7 }
 0x1eb   : > { %v2040_v52 = vadd.f32 %v2039_v31, %v2038_v28  ;;  %v1660_v58 = vsel %vm1470_vm3, %v3939_v13, 0.0  ;;  %v1662_v30 = vsel %vm1470_vm3, %v3975_v4, 0.0  ;;  %v2049_v50 = vsel %vm1470_vm3, %v1828_v19, 0.0  ;;  %p2950_p10 = pnand %p2949_p8, %p4649_p11  ;;  %p2956_p4 = scmp.lt.s32.totalorder %s2954_s9, %s2948_s6 }
 0x1ec   : > { %v1653_v25 = vadd.f32 %v1652_v46, %v1651_v24  ;;  %v2051_v45 = vsel %vm1470_vm3, %v1829_v1, 0.0  ;;  %v2053_v24 = vsel %vm1470_vm3, %v1830_v60, 0.0  ;;  %v1831_v31 = vmul.f32 %v4005_v39, %v4005_v39 }
 0x1ed   : > { %v2042_v44 = vadd.f32 %v2041_v27, %v2040_v52  ;;  %v1664_v13 = vsel %vm1470_vm3, %v4005_v39, 0.0  ;;  %v1832_v46 = vmul.f32 %v3971_v59, %v3971_v59  ;;  %v1666_v52 = vsel %vm1470_vm3, %v3971_v59, 0.0  ;;  %p2951_p0 = pneg %p2950_p10  ;;  %p2957_p5 = por %p2956_p4, %p2955_p2 }
 0x1ee   : > { %v1655_v35 = vadd.f32 %v1654_v17, %v1653_v25  ;;  %v1833_v27 = vmul.f32 %v3999_v23, %v3999_v23  ;;  %v1668_v39 = vsel %vm1470_vm3, %v3999_v23, 0.0  ;;  %v1672_v23 = vsel %vm1470_vm3, %v4045_v53, 0.0 }
 0x1ef   : > { %v2044_v61 = vadd.f32 %v2043_v37, %v2042_v44  ;;  %v2055_v44 = vsel %vm1470_vm3, %v1831_v31, 0.0  ;;  %v1834_v37 = vmul.f32 %v4033_v12, %v4033_v12  ;;  %v2057_v15 = vsel %vm1470_vm3, %v1832_v46, 0.0  ;;  %p2958_p7 = pnand %p2957_p5, %p2951_p0 }
 0x1f0   : > { %v1657_v63 = vadd.f32 %v1656_v49, %v1655_v35  ;;  %v2059_v49 = vsel %vm1470_vm3, %v1833_v27, 0.0  ;;  %v1836_v1 = vmul.f32 %v4009_v57, %v4009_v57  ;;  %v1837_v60 = vmul.f32 %v4041_v42, %v4041_v42 }
 0x1f1   : > { %v2046_v48 = vadd.f32 %v2045_v14, %v2044_v61  ;;  %v1670_v14 = vsel %vm1470_vm3, %v4033_v12, 0.0  ;;  %v1840_v46 = vmul.f32 %v4069_v3, %v4069_v3  ;;  %vm1732_vm4 = vcmask 516096  }
 0x1f2   : > { %v1659_v33 = vadd.f32 %v1658_v36, %v1657_v63  ;;  %v2061_v63 = vsel %vm1470_vm3, %v1834_v37, 0.0  ;;  %v1835_v36 = vmul.f32 %v4045_v53, %v4045_v53  ;;  %v1676_v53 = vsel %vm1470_vm3, %v4041_v42, 0.0 }
 0x1f3   : > { %v2048_v26 = vadd.f32 %v2047_v62, %v2046_v48  ;;  %v1680_v42 = vsel %vm1470_vm3, %v4097_v51, 0.0 }
 0x1f4   : > { %v1661_v21 = vadd.f32 %v1660_v58, %v1659_v33  ;;  %v1674_v33 = vsel %vm1470_vm3, %v4009_v57, 0.0 }
 0x1f5   : > { %v2050_v28 = vadd.f32 %v2049_v50, %v2048_v26  ;;  %v2063_v26 = vsel %vm1470_vm3, %v1835_v36, 0.0  ;;  %v1690_v36 = vsel %vm1470_vm3, %v4103_v56, 0.0 }
 0x1f6   : > { %v1663_v11 = vadd.f32 %v1662_v30, %v1661_v21  ;;  %v1838_v30 = vmul.f32 %v4075_v0, %v4075_v0  ;;  %v1678_v21 = vsel %vm1470_vm3, %v4075_v0, 0.0 }
 0x1f7   : > { %v2052_v9 = vadd.f32 %v2051_v45, %v2050_v28  ;;  %v2065_v28 = vsel %vm1470_vm3, %v1836_v1, 0.0 }
 0x1f8   : > { %v1665_v4 = vadd.f32 %v1664_v13, %v1663_v11  ;;  %v2067_v11 = vsel %vm1470_vm3, %v1837_v60, 0.0  ;;  %v2069_v31 = vsel %vm1470_vm3, %v1838_v30, 0.0  ;;  %v1694_v60 = vsel %vm1470_vm3, %v4159_v54, 0.0 }
 0x1f9   : > { %v2054_v17 = vadd.f32 %v2053_v24, %v2052_v9  ;;  %v1839_v9 = vmul.f32 %v4097_v51, %v4097_v51  ;;  %v1684_v51 = vsel %vm1470_vm3, %v4079_v47, 0.0 }
 0x1fa   : > { %v1667_v25 = vadd.f32 %v1666_v52, %v1665_v4  ;;  %v1682_v4 = vsel %vm1470_vm3, %v4069_v3, 0.0 }
 0x1fb   : > { %v2056_v35 = vadd.f32 %v2055_v44, %v2054_v17  ;;  %v1841_v17 = vmul.f32 %v4079_v47, %v4079_v47  ;;  %v1842_v44 = vmul.f32 %v4107_v41, %v4107_v41  ;;  %v1688_v47 = vsel %vm1470_vm3, %v4137_v40, 0.0 }
 0x1fc   : > { %v1669_v59 = vadd.f32 %v1668_v39, %v1667_v25  ;;  %v2071_v25 = vsel %vm1470_vm3, %v1839_v9, 0.0  ;;  %v1686_v39 = vsel %vm1470_vm3, %v4107_v41, 0.0 }
 0x1fd   : > { %v2058_v61 = vadd.f32 %v2057_v15, %v2056_v35  ;;  %v2073_v35 = vsel %vm1470_vm3, %v1840_v46, 0.0  ;;  %v2075_v15 = vsel %vm1470_vm3, %v1841_v17, 0.0  ;;  %v1702_v46 = vsel %vm1470_vm3, %v4199_v10, 0.0 }
 0x1fe   : > { %v1671_v19 = vadd.f32 %v1670_v14, %v1669_v59 }
 0x1ff   : > { %v2060_v48 = vadd.f32 %v2059_v49, %v2058_v61  ;;  %v2077_v61 = vsel %vm1470_vm3, %v1842_v44, 0.0  ;;  %v1843_v49 = vmul.f32 %v4137_v40, %v4137_v40  ;;  %v1692_v40 = vsel %vm1470_vm3, %v4131_v5, 0.0 }
 0x200   : > { %v1673_v12 = vadd.f32 %v1672_v23, %v1671_v19  ;;  %v1845_v23 = vmul.f32 %v4131_v5, %v4131_v5  ;;  %v1696_v5 = vsel %vm1470_vm3, %v4169_v20, 0.0 }
 0x201   : > { %v2062_v62 = vadd.f32 %v2061_v63, %v2060_v48  ;;  %v1844_v63 = vmul.f32 %v4103_v56, %v4103_v56 }
 0x202   : > { %v1675_v58 = vadd.f32 %v1674_v33, %v1673_v12  ;;  %v2079_v12 = vsel %vm1470_vm3, %v1843_v49, 0.0  ;;  %v1846_v33 = vmul.f32 %v4159_v54, %v4159_v54  ;;  %v2083_v30 = vsel %vm1470_vm3, %v1845_v23, 0.0 }
 0x203   : > { %v2064_v50 = vadd.f32 %v2063_v26, %v2062_v62  ;;  %v1856_v23 = vmul.f32 %v4227_v29, %v4227_v29 }
 0x204   : > { %v1677_v57 = vadd.f32 %v1676_v53, %v1675_v58  ;;  %v2081_v58 = vsel %vm1470_vm3, %v1844_v63, 0.0 }
 0x205   : > { %v2066_v45 = vadd.f32 %v2065_v28, %v2064_v50  ;;  %v2085_v50 = vsel %vm1470_vm3, %v1846_v33, 0.0  ;;  %v1857_v33 = vmul.f32 %v4255_v18, %v4255_v18 }
 0x206   : > { %v1679_v24 = vadd.f32 %v1678_v21, %v1677_v57  ;;  %v1847_v21 = vmul.f32 %v4169_v20, %v4169_v20  ;;  %v1848_v57 = vmul.f32 %v4141_v16, %v4141_v16  ;;  %v1700_v20 = vsel %vm1470_vm3, %v4165_v22, 0.0 }
 0x207   : > { %v2068_v13 = vadd.f32 %v2067_v11, %v2066_v45  ;;  %v1698_v45 = vsel %vm1470_vm3, %v4141_v16, 0.0 }
 0x208   : > { %v1681_v0 = vadd.f32 %v1680_v42, %v1679_v24  ;;  %v1849_v24 = vmul.f32 %v4165_v22, %v4165_v22  ;;  %v2087_v9 = vsel %vm1470_vm3, %v1847_v21, 0.0  ;;  %v1704_v22 = vsel %vm1470_vm3, %v4221_v2, 0.0 }
 0x209   : > { %v2070_v52 = vadd.f32 %v2069_v31, %v2068_v13  ;;  %v1850_v13 = vmul.f32 %v4199_v10, %v4199_v10 }
 0x20a   : > { %v1683_v27 = vadd.f32 %v1682_v4, %v1681_v0  ;;  %v2089_v0 = vsel %vm1470_vm3, %v1848_v57, 0.0  ;;  %v1860_v57 = vmul.f32 %v4265_v6, %v4265_v6 }
 0x20b   : > { %v2072_v37 = vadd.f32 %v2071_v25, %v2070_v52  ;;  %v2091_v52 = vsel %vm1470_vm3, %v1849_v24, 0.0  ;;  %v1851_v25 = vmul.f32 %v4221_v2, %v4221_v2  ;;  %v1708_v2 = vsel %vm1470_vm3, %v4203_v7, 0.0 }
 0x20c   : > { %v1685_v3 = vadd.f32 %v1684_v51, %v1683_v27  ;;  %v2093_v27 = vsel %vm1470_vm3, %v1850_v13, 0.0  ;;  %v1852_v51 = vmul.f32 %v4193_v34, %v4193_v34 }
 0x20d   : > { %v2074_v14 = vadd.f32 %v2073_v35, %v2072_v37  ;;  %v1706_v37 = vsel %vm1470_vm3, %v4193_v34, 0.0  ;;  %v1853_v35 = vmul.f32 %v4203_v7, %v4203_v7  ;;  %v1712_v7 = vsel %vm1470_vm3, %v4261_v8, 0.0 }
 0x20e   : > { %v1687_v59 = vadd.f32 %v1686_v39, %v1685_v3  ;;  %v2097_v49 = vsel %vm1470_vm3, %v1852_v51, 0.0 }
 0x20f   : > { %v2076_v19 = vadd.f32 %v2075_v15, %v2074_v14  ;;  %v2095_v14 = vsel %vm1470_vm3, %v1851_v25, 0.0  ;;  %v1854_v15 = vmul.f32 %v4231_v43, %v4231_v43 }
 0x210   : > { %v1689_v41 = vadd.f32 %v1688_v47, %v1687_v59  ;;  %v2099_v47 = vsel %vm1470_vm3, %v1853_v35, 0.0 }
 0x211   : > { %v2078_v48 = vadd.f32 %v2077_v61, %v2076_v19  ;;  %v1710_v61 = vsel %vm1470_vm3, %v4231_v43, 0.0 }
 0x212   : > { %v1691_v1 = vadd.f32 %v1690_v36, %v1689_v41  ;;  %v2101_v41 = vsel %vm1470_vm3, %v1854_v15, 0.0  ;;  %v1855_v36 = vmul.f32 %v4261_v8, %v4261_v8  ;;  %v1716_v8 = vsel %vm1470_vm3, %v4255_v18, 0.0 }
 0x213   : > { %v2080_v62 = vadd.f32 %v2079_v12, %v2078_v48  ;;  %v1720_v18 = vsel %vm1470_vm3, %v4302_v55, 0.0 }
 0x214   : > { %v1693_v56 = vadd.f32 %v1692_v40, %v1691_v1  ;;  %v1714_v1 = vsel %vm1470_vm3, %v4227_v29, 0.0 }
 0x215   : > { %v2082_v26 = vadd.f32 %v2081_v58, %v2080_v62  ;;  %v2103_v62 = vsel %vm1470_vm3, %v1855_v36, 0.0 }
 0x216   : > { %v1695_v53 = vadd.f32 %v1694_v60, %v1693_v56  ;;  %v1858_v60 = vmul.f32 %v4285_v32, %v4285_v32  ;;  %v1718_v56 = vsel %vm1470_vm3, %v4285_v32, 0.0 }
 0x217   : > { %v2084_v28 = vadd.f32 %v2083_v30, %v2082_v26  ;;  %v2105_v26 = vsel %vm1470_vm3, %v1856_v23, 0.0 }
 0x218   : > { %v1697_v54 = vadd.f32 %v1696_v5, %v1695_v53  ;;  %v2107_v53 = vsel %vm1470_vm3, %v1857_v33, 0.0  ;;  %v2109_v21 = vsel %vm1470_vm3, %v1858_v60, 0.0 }
 0x219   : > { %v2086_v11 = vadd.f32 %v2085_v50, %v2084_v28  ;;  %v1859_v28 = vmul.f32 %v4302_v55, %v4302_v55  ;;  %v2113_v55 = vsel %vm1470_vm3, %v1860_v57, 0.0 }
 0x21a   : > { %v1699_v31 = vadd.f32 %v1698_v45, %v1697_v54  ;;  %v1722_v54 = vsel %vm1470_vm3, %v4265_v6, 0.0 }
 0x21b   : > { %v2088_v42 = vadd.f32 %v2087_v9, %v2086_v11  ;;  %v1861_v11 = vmul.f32 %v4298_v38, %v4298_v38  ;;  %v1724_v9 = vsel %vm1470_vm3, %v4298_v38, 0.0 }
 0x21c   : > { %v1701_v16 = vadd.f32 %v1700_v20, %v1699_v31  ;;  %v2111_v31 = vsel %vm1470_vm3, %v1859_v28, 0.0 }
 0x21d   : > { %v2090_v4 = vadd.f32 %v2089_v0, %v2088_v42 }
 0x21e   : > { %v1703_v17 = vadd.f32 %v1702_v46, %v1701_v16  ;;  %v2115_v46 = vsel %vm1470_vm3, %v1861_v11, 0.0 }
 0x21f   : > { %v2092_v44 = vadd.f32 %v2091_v52, %v2090_v4 }
 0x220   : > { %v1705_v10 = vadd.f32 %v1704_v22, %v1703_v17 }
 0x221   : > { %v2094_v39 = vadd.f32 %v2093_v27, %v2092_v44 }
 0x222   : > { %v1707_v3 = vadd.f32 %v1706_v37, %v1705_v10 }
 0x223   : > { %v2096_v59 = vadd.f32 %v2095_v14, %v2094_v39 }
 0x224   : > { %v1709_v34 = vadd.f32 %v1708_v2, %v1707_v3 }
 0x225   : > { %v2098_v19 = vadd.f32 %v2097_v49, %v2096_v59 }
 0x226   : > { %v1711_v63 = vadd.f32 %v1710_v61, %v1709_v34 }
 0x227   : > { %v2100_v48 = vadd.f32 %v2099_v47, %v2098_v19 }
 0x228   : > { %v1713_v43 = vadd.f32 %v1712_v7, %v1711_v63 }
 0x229   : > { %v2102_v12 = vadd.f32 %v2101_v41, %v2100_v48 }
 0x22a   : > { %v1715_v40 = vadd.f32 %v1714_v1, %v1713_v43 }
 0x22b   : > { %v2104_v58 = vadd.f32 %v2103_v62, %v2102_v12 }
 0x22c   : > { %v1717_v29 = vadd.f32 %v1716_v8, %v1715_v40 }
 0x22d   : > { %v2106_v30 = vadd.f32 %v2105_v26, %v2104_v58 }
 0x22e   : > { %v1719_v50 = vadd.f32 %v1718_v56, %v1717_v29 }
 0x22f   : > { %v2108_v5 = vadd.f32 %v2107_v53, %v2106_v30 }
 0x230   : > { %v1721_v32 = vadd.f32 %v1720_v18, %v1719_v50 }
 0x231   : > { %v2110_v45 = vadd.f32 %v2109_v21, %v2108_v5 }
 0x232   : > { %v1723_v24 = vadd.f32 %v1722_v54, %v1721_v32 }
 0x233   : > { %v2112_v13 = vadd.f32 %v2111_v31, %v2110_v45 }
 0x234   : > { %v1725_v20 = vadd.f32 %v1724_v9, %v1723_v24 }
 0x235   : > { %v2114_v42 = vadd.f32 %v2113_v55, %v2112_v13 }
 0x236   : > { %v1726_v6 = vrot.slane %v1725_v20, 4 }
 0x237   : > { %v2116_v0 = vadd.f32 %v2115_v46, %v2114_v42 }
 0x238   : > { %v1727_v16 = vadd.f32 %v1726_v6, %v1725_v20 }
 0x239   : > { %v2117_v4 = vrot.slane %v2116_v0, 4 }
 0x23a   : > { %v1728_v52 = vrot.slane %v1727_v16, 2 }
 0x23b   : > { %v2118_v17 = vadd.f32 %v2117_v4, %v2116_v0 }
 0x23c   : > { %v1729_v27 = vadd.f32 %v1728_v52, %v1727_v16 }
 0x23d   : > { %v2119_v25 = vrot.slane %v2118_v17, 2 }
 0x23e   : > { %v1730_v44 = vrot.slane %v1729_v27, 1 }
 0x23f   : > { %v2120_v38 = vadd.f32 %v2119_v25, %v2118_v17 }
 0x240   : > { %v1731_v22 = vadd.f32 %v1730_v44, %v1729_v27 }
 0x241   : > { %v2121_v51 = vrot.slane %v2120_v38, 1 }
 0x242   : > { %1733 = vst.msk [vmem:[%s227_s23] sm:$0x1] %vm1732_vm4, %v1731_v22 }
 0x243   : > { %v2122_v10 = vadd.f32 %v2121_v51, %v2120_v38 }
 0x245   : > { %2123 = vst.msk [vmem:[%s227_s23 + $0x1] sm:$0x1] %vm1732_vm4, %v2122_v10 }
 0x246   : > { %2961 = shalt.err (!%p2958_p7)
}
 0x247   : > { %s2962_s13 = scalar_lea.hbm %s4553_s30, 32  ;;  %s2966_s22 = scalar_lea.hbm %s4601_s4, 64 }
 0x248   : > { %p2963_p9 = scmp.ne.s32.totalorder %s4553_s30, %s2962_s13  ;;  %p2967_p6 = scmp.lt.u32.totalorder %s4553_s30, %s4601_s4 }
 0x249   : > { %p2968_p12 = scmp.lt.u32.totalorder %s2966_s22, %s2962_s13  ;;  %p2970_p8 = scmp.lt.u32.totalorder %s2962_s13, %s4553_s30 }
 0x24a   : > { %p2964_p1 = pnand %p2963_p9, %p4649_p11 }
 0x24b   : > { %p2969_p13 = por %p2968_p12, %p2967_p6 }
 0x24c   : > { %p2965_p3 = pneg %p2964_p1 }
 0x24d   : > { %p2971_p10 = por %p2970_p8, %p2969_p13 }
 0x24f   : > { %p2972_p0 = pnand %p2971_p10, %p2965_p3 }
 0x251   : > { %2975 = shalt.err (!%p2972_p0)
}
 0x252   : > { %2767 = dma.vmem_to_hbm [thread:$0]  (%p4649_p11), %s4555_s25, 32, %s4553_s30, %s2258_s5  }
 0x253 PF: > { %s2300_s10 = sand.u32 1, %s3006_s15   ;;  %p4653_p2 = scmp.ne.s32.totalorder %s4628_s28, 0 }
 0x254   : > { %p4654_p4 = scmp.ge.s32.totalorder %s3018_s18, 2  ;;  %s2301_s12 = scalar_lea.sflag [#allocation4], %s2300_s10 }
 0x256   : > { %p2775_p5 = pnand %p4654_p4, %p4653_p2 }
 0x258   : > { %2997 = dma.done.wait (!%p2775_p5), %s2301_s12, 16384  }
 0x259   : > { %2999 = vsyncadd (!%p2775_p5), %s2301_s12, 4294950912  ;;  %s2310_s23 = scalar_lea.sflag [#allocation7], %s2300_s10 }
 0x25a   : > { %3001 = dma.done.wait (!%p2775_p5), %s2310_s23, 32  }
 0x25b   : > { %3003 = vsyncadd (!%p2775_p5), %s2310_s23, 4294967264  ;;  %p21_p11 = scmp.ge.s32.totalorder %s3078_s21, 4   ;;  %s4655_s15 = smov %s3010_s16 }
 0x25c   : > { %s4656_s16 = smov %s3014_s17  ;;  %s4657_s17 = smov %s3090_s24 }
 0x25d   : > { %s4658_s18 = smov %s3078_s21  ;;  %23 = sbr.rel (!%p21_p11) target bundleno = 7 (0x7), region = 94 }
 0x264   :  { %2315 = vsyncpa [#allocation3], 1 }
 0x265   :  { %2317 = vsyncpa [#allocation3 + $0x1], 1 }
 0x266   :  { %2318 = vsyncpa [#allocation4], 1 }
 0x267   :  { %2320 = vsyncpa [#allocation4 + $0x1], 1 }
 0x268   :  { %2321 = vsyncpa [#allocation7], 1 }
 0x269   :  { %2323 = vsyncpa [#allocation7 + $0x1], 1 }

</bundles_post_ra>
